<compile_context>
chip_gen: v6e
topology: v6e:2x2x1
jax: 0.10.0
libtpu: 0.0.40
codegen_flags: <defaults>
</compile_context>

<pallas_src>
import functools
import math

import numpy as np
import jax
import jax.numpy as jnp
from jax.experimental import pallas as pl
from jax.experimental.pallas import tpu as pltpu

# Globals mirrored from the original script scope.
n_heads = 4
dropout = 0.0


# -----------------------------------------------------------------------------
# Fused kernel: per-sample linear transform + logits (d == 0), then masked
# softmax + weighted aggregation for one dst tile.
# -----------------------------------------------------------------------------
def _gat_kernel(x_ref, xT_ref, wc_ref, wasrcT_ref, adj_ref, bias_ref, out_ref,
                h_vmem, asrcT_vmem, adst_vmem, *, H, C, TMD):
    HC = H * C
    d = pl.program_id(1)

    # ---- once per sample: h, a_dst, a_srcT into VMEM scratch ----------------
    @pl.when(d == 0)
    def _():
        # h2 = x @ [W | W @ A_dst_pad]  -> [N, HC + Hp]
        h2 = jnp.dot(x_ref[...], wc_ref[...], preferred_element_type=jnp.float32)
        h_vmem[...] = h2[:, :HC]
        adst_vmem[...] = h2[:, HC:]
        # a_src directly in [Hp, N] lane layout: (W @ A_src)^T @ x^T
        asrcT_vmem[...] = jnp.dot(wasrcT_ref[...], xT_ref[...],
                                  preferred_element_type=jnp.float32)

    # ---- per dst tile: hoisted ref reads ------------------------------------
    row0 = pl.multiple_of(d * TMD, TMD)
    adst = adst_vmem[pl.ds(row0, TMD), :]            # [TMD, Hp]  f32
    asrcT = asrcT_vmem[...]                          # [Hp,  N ]  f32
    h = h_vmem[...]                                  # [N,  HC ]  f32
    adj = adj_ref[...]                               # [TMD, N ]  int8 (self-loops)
    bias = bias_ref[...]                             # [1,  HC ]  f32

    parts = []
    for hh in range(H):                              # H small & static -> unrolled
        e = adst[:, hh:hh + 1] + asrcT[hh:hh + 1, :]      # [TMD, N]
        e = jnp.where(e > 0, e, 0.2 * e)                  # leaky_relu(0.2)
        e = jnp.where(adj != 0, e, -1e30)                 # int8 mask, no f32 bias
        m = jnp.max(e, axis=-1, keepdims=True)
        p = jnp.exp(e - m)
        ssum = jnp.sum(p, axis=-1, keepdims=True)         # [TMD, 1]
        out_h = jnp.dot(p, h[:, hh * C:(hh + 1) * C],
                        preferred_element_type=jnp.float32)   # [TMD, C]
        # Deferred softmax normalization on the small result (EUP reciprocal).
        parts.append(out_h * pl.reciprocal(ssum, approx=True))
    # Single lane-dense [TMD, HC] store with fused bias add.
    out_ref[...] = jnp.concatenate(parts, axis=-1) + bias


# -----------------------------------------------------------------------------
# Wrapper
# -----------------------------------------------------------------------------
def gat_layer_pallas(x3, adj_blocks, Wc, WAsrcT, bias, *, N, H, C, TMD):
    """x3: [S, N_pad, F_in] f32 (zero-padded rows), adj_blocks: [S, N_pad, N_pad] int8."""
    S, N_pad, F_in = x3.shape
    HC = H * C
    Hp = WAsrcT.shape[0]
    assert N_pad % 128 == 0, "source/lane axis must be padded to a multiple of 128"
    assert N_pad % TMD == 0 and TMD % 32 == 0

    xT3 = jnp.swapaxes(x3, 1, 2)                     # [S, F_in, N_pad] (tiny)
    bias2 = bias.reshape(1, HC)

    out3 = pl.pallas_call(
        functools.partial(_gat_kernel, H=H, C=C, TMD=TMD),
        out_shape=jax.ShapeDtypeStruct((S, N_pad, HC), jnp.float32),
        grid=(S, N_pad // TMD),
        in_specs=[
            pl.BlockSpec((None, N_pad, F_in), lambda s, d: (s, 0, 0)),   # x
            pl.BlockSpec((None, F_in, N_pad), lambda s, d: (s, 0, 0)),   # x^T
            pl.BlockSpec((F_in, HC + Hp), lambda s, d: (0, 0)),          # [W | W@A_dst]
            pl.BlockSpec((Hp, F_in), lambda s, d: (0, 0)),               # (W@A_src)^T
            pl.BlockSpec((None, TMD, N_pad), lambda s, d: (s, d, 0)),    # adjacency
            pl.BlockSpec((1, HC), lambda s, d: (0, 0)),                  # bias
        ],
        out_specs=pl.BlockSpec((None, TMD, HC), lambda s, d: (s, d, 0)),
        scratch_shapes=[
            pltpu.VMEM((N_pad, HC), jnp.float32),    # h (per sample)
            pltpu.VMEM((Hp, N_pad), jnp.float32),    # a_src^T
            pltpu.VMEM((N_pad, Hp), jnp.float32),    # a_dst
        ],
        compiler_params=pltpu.CompilerParams(
            dimension_semantics=("parallel", "arbitrary")),
    )(x3, xT3, Wc, WAsrcT, adj_blocks, bias2)

    return out3[:, :N, :].reshape(S * N, HC)


# -----------------------------------------------------------------------------
# Host-side parameter prep: fold att_src / att_dst into the weight matrix.
# -----------------------------------------------------------------------------
def prepare_params(W, att_src, att_dst, H, C):
    """Returns Wc = [W | W @ A_dst]  ([F_in, HC+Hp]) and (W @ A_src)^T ([Hp, F_in])."""
    HC = H * C
    Hp = ((H + 7) // 8) * 8                           # sublane-pad the head axis
    A_src = np.zeros((HC, Hp), dtype=np.float32)
    A_dst = np.zeros((HC, Hp), dtype=np.float32)
    a_s = np.asarray(att_src, dtype=np.float32)
    a_d = np.asarray(att_dst, dtype=np.float32)
    for hh in range(H):
        A_src[hh * C:(hh + 1) * C, hh] = a_s[hh]
        A_dst[hh * C:(hh + 1) * C, hh] = a_d[hh]
    W_np = np.asarray(W, dtype=np.float32)
    Wc = np.concatenate([W_np, W_np @ A_dst], axis=1)     # [F_in, HC + Hp]
    WAsrcT = (W_np @ A_src).T                              # [Hp, F_in]
    return jnp.asarray(Wc), jnp.asarray(WAsrcT)


# -----------------------------------------------------------------------------
# Glue: cumulative_edgeIndex (host-side, mirrors the PyTorch helper) + adjacency
# -----------------------------------------------------------------------------
def cumulative_edge_index(edge_index, bond_dist, N):
    S, _, B2 = edge_index.shape
    ei_list, bd_list = [], []
    for s in range(S):
        b = int(np.sum(edge_index[s, 0, :] != edge_index[s, 1, :]))
        ei_list.append(edge_index[s, :, :b] + s * N)
        bd_list.append(bond_dist[s, :b])
    return (np.concatenate(ei_list, axis=-1),
            np.concatenate(bd_list, axis=0))


def build_block_adjacency(edge_idx, S, N):
    """Per-sample int8 adjacency adj[s, dst, src] with self-loops (block-diagonal)."""
    adj = np.zeros((S, N, N), dtype=np.int8)
    diag = np.arange(N)
    for s in range(S):
        adj[s, diag, diag] = 1                         # add_self_loops
    src, dst = edge_idx[0], edge_idx[1]
    adj[dst // N, dst % N, src % N] = 1                # src -> dst messages
    return adj


def pad_for_kernel(x_flat, adj_blocks, S, N, lane=128):
    """Zero-pad the per-sample node axis to a multiple of 128 (lane-dense kernel)."""
    F_in = x_flat.shape[-1]
    N_pad = ((N + lane - 1) // lane) * lane
    x3 = np.zeros((S, N_pad, F_in), dtype=np.float32)
    x3[:, :N, :] = np.asarray(x_flat, dtype=np.float32).reshape(S, N, F_in)
    adj_pad = np.zeros((S, N_pad, N_pad), dtype=np.int8)
    adj_pad[:, :N, :N] = adj_blocks                    # padded cols stay masked out
    return jnp.asarray(x3), jnp.asarray(adj_pad), N_pad


def blocks_to_dense(adj_blocks):
    S, N, _ = adj_blocks.shape
    adj = np.zeros((S * N, S * N), dtype=np.float32)
    for s in range(S):
        adj[s * N:(s + 1) * N, s * N:(s + 1) * N] = adj_blocks[s]
    return adj


# -----------------------------------------------------------------------------
# Pure-JAX reference (dense full-graph formulation) for the correctness check.
# -----------------------------------------------------------------------------
def gat_reference(x_flat, adj_full, W, att_src, att_dst, bias, H, C):
    h = x_flat @ W
    h3 = h.reshape(-1, H, C)
    asrc = jnp.einsum('nhc,hc->nh', h3, att_src)
    adst = jnp.einsum('nhc,hc->nh', h3, att_dst)
    e = adst[:, None, :] + asrc[None, :, :]
    e = jnp.where(e > 0, e, 0.2 * e)
    e = jnp.where(adj_full[:, :, None] > 0, e, -1e30)
    alpha = jax.nn.softmax(e, axis=1)
    out = jnp.einsum('nsh,shc->nhc', alpha, h3).reshape(-1, H * C) + bias
    return out


# -----------------------------------------------------------------------------
if __name__ == "__main__":
    # Small shapes consistent with the module (N=558 in the original is just a
    # per-sample node count; we parameterize it and use N=100 -> padded to 128).
    S, N, F_in = 2, 100, 16         # batch, nodes/sample, input features
    dim_out = 32                    # GATConv out_channels per head
    H, C = n_heads, dim_out
    B2 = 40                         # padded edge slots per sample
    TMD = 64                        # dst-node tile (multiple of 32, divides N_pad)
    n_total = S * N

    key = jax.random.PRNGKey(0)
    k_x, k_src, k_off, k_bd, k_w, k_as, k_ad, k_b = jax.random.split(key, 8)

    # Inputs
    x_data = jax.random.normal(k_x, (S, N, F_in), dtype=jnp.float32)
    src = np.array(jax.random.randint(k_src, (S, B2), 0, N))
    off = np.array(jax.random.randint(k_off, (S, B2), 1, N))
    dst = (src + off) % N                                 # guarantees src != dst
    edge_index = np.stack([src, dst], axis=1).astype(np.int32)   # [S, 2, B2]
    b_counts = [30, 25]
    for s in range(S):
        edge_index[s, :, b_counts[s]:] = 0                # padding (src == dst)
    bond_dist = np.abs(np.array(jax.random.normal(k_bd, (S, B2)))) + 0.1

    # Deterministic GATConv parameters (glorot-ish).
    W = jax.random.normal(k_w, (F_in, H * C), jnp.float32) / math.sqrt(F_in)
    att_src = jax.random.normal(k_as, (H, C), jnp.float32) * 0.1
    att_dst = jax.random.normal(k_ad, (H, C), jnp.float32) * 0.1
    bias = jax.random.normal(k_b, (H * C,), jnp.float32) * 0.01

    # Forward-pass glue mirroring the PyTorch module.
    edge_idx, bond_distance = cumulative_edge_index(edge_index, bond_dist, N)
    x_flat = x_data.reshape(-1, F_in)                     # x_data.view(-1, F)
    bond_distance = bond_distance / bond_distance.max()   # unused (edge_dim=None)

    adj_blocks_np = build_block_adjacency(edge_idx, S, N)
    x3, adj_pad, N_pad = pad_for_kernel(x_flat, adj_blocks_np, S, N)
    Wc, WAsrcT = prepare_params(W, att_src, att_dst, H, C)

    out = gat_layer_pallas(x3, adj_pad, Wc, WAsrcT, bias,
                           N=N, H=H, C=C, TMD=TMD)
    out = jax.block_until_ready(out)

    adj_full = jnp.asarray(blocks_to_dense(adj_blocks_np))
    ref = gat_reference(x_flat, adj_full, W, att_src, att_dst, bias, H, C)
    # Tolerance loosened slightly for pl.reciprocal(approx=True).
    np.testing.assert_allclose(np.array(out), np.array(ref),
                               rtol=5e-3, atol=5e-3)

    assert out.shape == (n_total, H * C)
    print("KERNEL_OK")
</pallas_src>

<mosaic_0001>
module attributes {stable_mosaic.version = 11 : i64} {
  func.func @_gat_kernel(%arg0: i32, %arg1: i32, %arg2: memref<1x128x16xf32, #tpu.memory_space<vmem>>, %arg3: memref<1x16x128xf32, #tpu.memory_space<vmem>>, %arg4: memref<16x136xf32, #tpu.memory_space<vmem>>, %arg5: memref<8x16xf32, #tpu.memory_space<vmem>>, %arg6: memref<1x64x128xi8, #tpu.memory_space<vmem>>, %arg7: memref<1x128xf32, #tpu.memory_space<vmem>>, %arg8: memref<1x64x128xf32, #tpu.memory_space<vmem>>, %arg9: memref<128x128xf32, #tpu.memory_space<vmem>>, %arg10: memref<8x128xf32, #tpu.memory_space<vmem>>, %arg11: memref<128x8xf32, #tpu.memory_space<vmem>>) attributes {dimension_semantics = [#tpu.dimension_semantics<parallel>, #tpu.dimension_semantics<arbitrary>], iteration_bounds = array<i64: 2, 2>, scalar_prefetch = 0 : i64, scratch_operands = 3 : i64, tpu.core_type = #tpu.core_type<tc>, window_params = [{transform_indices = @transform_0, window_bounds = array<i64: 1, 128, 16>}, {transform_indices = @transform_1, window_bounds = array<i64: 1, 16, 128>}, {pipeline_mode = #tpu.pipeline_mode<synchronous>, transform_indices = @transform_2, window_bounds = array<i64: 16, 136>}, {pipeline_mode = #tpu.pipeline_mode<synchronous>, transform_indices = @transform_3, window_bounds = array<i64: 8, 16>}, {transform_indices = @transform_4, window_bounds = array<i64: 1, 64, 128>}, {pipeline_mode = #tpu.pipeline_mode<synchronous>, transform_indices = @transform_5, window_bounds = array<i64: 1, 128>}, {transform_indices = @transform_6, window_bounds = array<i64: 1, 64, 128>}]} {
    %c0_i32 = arith.constant 0 : i32
    %0 = arith.cmpi eq, %arg1, %c0_i32 : i32
    %1 = arith.extui %0 : i1 to i32
    %c0_i32_0 = arith.constant 0 : i32
    %2 = arith.cmpi ne, %1, %c0_i32_0 : i32
    scf.if %2 {
      %c0_39 = arith.constant 0 : index
      %c0_40 = arith.constant 0 : index
      %c0_41 = arith.constant 0 : index
      %122 = vector.load %arg2[%c0_39, %c0_40, %c0_41] : memref<1x128x16xf32, #tpu.memory_space<vmem>>, vector<1x128x16xf32>
      %123 = vector.shape_cast %122 : vector<1x128x16xf32> to vector<128x16xf32>
      %c0_42 = arith.constant 0 : index
      %c0_43 = arith.constant 0 : index
      %124 = vector.load %arg4[%c0_42, %c0_43] : memref<16x136xf32, #tpu.memory_space<vmem>>, vector<16x136xf32>
      %cst_44 = arith.constant dense<0.000000e+00> : vector<128x136xf32>
      %125 = tpu.matmul %123, %124, %cst_44 {dimension_numbers = #tpu.dot_dimension_numbers<[1], [0], [0], [1], [0, 0, 1, 1], [], []>} : vector<128x16xf32>, vector<16x136xf32>, vector<128x136xf32> -> vector<128x136xf32>
      %126 = vector.extract_strided_slice %125 {offsets = [0, 0], sizes = [128, 128], strides = [1, 1]} : vector<128x136xf32> to vector<128x128xf32>
      %c0_45 = arith.constant 0 : index
      %c0_46 = arith.constant 0 : index
      %127 = vector.load %arg9[%c0_45, %c0_46] : memref<128x128xf32, #tpu.memory_space<vmem>>, vector<128x128xf32>
      tpu.vector_store %arg9[%c0_45, %c0_46], %126 {strides = array<i32>} : memref<128x128xf32, #tpu.memory_space<vmem>>, vector<128x128xf32>,
      %128 = vector.extract_strided_slice %125 {offsets = [0, 128], sizes = [128, 8], strides = [1, 1]} : vector<128x136xf32> to vector<128x8xf32>
      %c0_47 = arith.constant 0 : index
      %c0_48 = arith.constant 0 : index
      %129 = vector.load %arg11[%c0_47, %c0_48] : memref<128x8xf32, #tpu.memory_space<vmem>>, vector<128x8xf32>
      tpu.vector_store %arg11[%c0_47, %c0_48], %128 {strides = array<i32>} : memref<128x8xf32, #tpu.memory_space<vmem>>, vector<128x8xf32>,
      %c0_49 = arith.constant 0 : index
      %c0_50 = arith.constant 0 : index
      %130 = vector.load %arg5[%c0_49, %c0_50] : memref<8x16xf32, #tpu.memory_space<vmem>>, vector<8x16xf32>
      %c0_51 = arith.constant 0 : index
      %c0_52 = arith.constant 0 : index
      %c0_53 = arith.constant 0 : index
      %131 = vector.load %arg3[%c0_51, %c0_52, %c0_53] : memref<1x16x128xf32, #tpu.memory_space<vmem>>, vector<1x16x128xf32>
      %132 = vector.shape_cast %131 : vector<1x16x128xf32> to vector<16x128xf32>
      %cst_54 = arith.constant dense<0.000000e+00> : vector<8x128xf32>
      %133 = tpu.matmul %130, %132, %cst_54 {dimension_numbers = #tpu.dot_dimension_numbers<[1], [0], [0], [1], [0, 0, 1, 1], [], []>} : vector<8x16xf32>, vector<16x128xf32>, vector<8x128xf32> -> vector<8x128xf32>
      %c0_55 = arith.constant 0 : index
      %c0_56 = arith.constant 0 : index
      %134 = vector.load %arg10[%c0_55, %c0_56] : memref<8x128xf32, #tpu.memory_space<vmem>>, vector<8x128xf32>
      tpu.vector_store %arg10[%c0_55, %c0_56], %133 {strides = array<i32>} : memref<8x128xf32, #tpu.memory_space<vmem>>, vector<8x128xf32>,
    } else {
    }
    %c64_i32 = arith.constant 64 : i32
    %3 = arith.muli %arg1, %c64_i32 : i32
    %4 = tpu.assume_multiple %3, 64 : i32
    %5 = arith.index_cast %4 : i32 to index
    %c0 = arith.constant 0 : index
    %6 = vector.load %arg11[%5, %c0] : memref<128x8xf32, #tpu.memory_space<vmem>>, vector<64x8xf32>
    %c0_1 = arith.constant 0 : index
    %c0_2 = arith.constant 0 : index
    %7 = vector.load %arg10[%c0_1, %c0_2] : memref<8x128xf32, #tpu.memory_space<vmem>>, vector<8x128xf32>
    %c0_3 = arith.constant 0 : index
    %c0_4 = arith.constant 0 : index
    %8 = vector.load %arg9[%c0_3, %c0_4] : memref<128x128xf32, #tpu.memory_space<vmem>>, vector<128x128xf32>
    %c0_5 = arith.constant 0 : index
    %c0_6 = arith.constant 0 : index
    %c0_7 = arith.constant 0 : index
    %9 = vector.load %arg6[%c0_5, %c0_6, %c0_7] : memref<1x64x128xi8, #tpu.memory_space<vmem>>, vector<1x64x128xi8>
    %10 = vector.shape_cast %9 : vector<1x64x128xi8> to vector<64x128xi8>
    %c0_8 = arith.constant 0 : index
    %c0_9 = arith.constant 0 : index
    %11 = vector.load %arg7[%c0_8, %c0_9] : memref<1x128xf32, #tpu.memory_space<vmem>>, vector<1x128xf32>
    %12 = vector.extract_strided_slice %6 {offsets = [0, 0], sizes = [64, 1], strides = [1, 1]} : vector<64x8xf32> to vector<64x1xf32>
    %13 = vector.extract_strided_slice %7 {offsets = [0, 0], sizes = [1, 128], strides = [1, 1]} : vector<8x128xf32> to vector<1x128xf32>
    %14 = vector.broadcast %12 : vector<64x1xf32> to vector<64x128xf32>
    %15 = vector.broadcast %13 : vector<1x128xf32> to vector<64x128xf32>
    %16 = arith.addf %14, %15 : vector<64x128xf32>
    %cst = arith.constant 0.000000e+00 : f32
    %17 = vector.broadcast %cst : f32 to vector<64x128xf32>
    %18 = arith.cmpf ogt, %16, %17 : vector<64x128xf32>
    %cst_10 = arith.constant 2.000000e-01 : f32
    %19 = vector.broadcast %cst_10 : f32 to vector<64x128xf32>
    %20 = arith.mulf %19, %16 : vector<64x128xf32>
    %21 = arith.select %18, %16, %20 : vector<64x128xi1>, vector<64x128xf32>
    %c0_i8 = arith.constant 0 : i8
    %22 = vector.broadcast %c0_i8 : i8 to vector<64x128xi8>
    %23 = arith.cmpi ne, %10, %22 : vector<64x128xi8>
    %cst_11 = arith.constant -1.000000e+30 : f32
    %24 = vector.broadcast %cst_11 : f32 to vector<64x128xf32>
    %25 = arith.select %23, %21, %24 : vector<64x128xi1>, vector<64x128xf32>
    %cst_12 = arith.constant dense<0xFF800000> : vector<64xf32>
    %26 = vector.multi_reduction <maximumf>, %25, %cst_12 [1] : vector<64x128xf32> to vector<64xf32>
    %27 = vector.shape_cast %26 : vector<64xf32> to vector<64x1xf32>
    %28 = vector.broadcast %27 : vector<64x1xf32> to vector<64x128xf32>
    %29 = arith.subf %25, %28 : vector<64x128xf32>
    %30 = math.exp %29 : vector<64x128xf32>
    %cst_13 = arith.constant dense<0.000000e+00> : vector<64xf32>
    %31 = vector.multi_reduction <add>, %30, %cst_13 [1] : vector<64x128xf32> to vector<64xf32>
    %32 = vector.shape_cast %31 : vector<64xf32> to vector<64x1xf32>
    %33 = vector.extract_strided_slice %8 {offsets = [0, 0], sizes = [128, 32], strides = [1, 1]} : vector<128x128xf32> to vector<128x32xf32>
    %cst_14 = arith.constant dense<0.000000e+00> : vector<64x32xf32>
    %34 = tpu.matmul %30, %33, %cst_14 {dimension_numbers = #tpu.dot_dimension_numbers<[1], [0], [0], [1], [0, 0, 1, 1], [], []>} : vector<64x128xf32>, vector<128x32xf32>, vector<64x32xf32> -> vector<64x32xf32>
    %35 = tpu.reciprocal %32 {approx = true} : vector<64x1xf32> -> vector<64x1xf32>
    %36 = vector.broadcast %35 : vector<64x1xf32> to vector<64x32xf32>
    %37 = arith.mulf %34, %36 : vector<64x32xf32>
    %38 = vector.extract_strided_slice %6 {offsets = [0, 1], sizes = [64, 1], strides = [1, 1]} : vector<64x8xf32> to vector<64x1xf32>
    %39 = vector.extract_strided_slice %7 {offsets = [1, 0], sizes = [1, 128], strides = [1, 1]} : vector<8x128xf32> to vector<1x128xf32>
    %40 = vector.broadcast %38 : vector<64x1xf32> to vector<64x128xf32>
    %41 = vector.broadcast %39 : vector<1x128xf32> to vector<64x128xf32>
    %42 = arith.addf %40, %41 : vector<64x128xf32>
    %cst_15 = arith.constant 0.000000e+00 : f32
    %43 = vector.broadcast %cst_15 : f32 to vector<64x128xf32>
    %44 = arith.cmpf ogt, %42, %43 : vector<64x128xf32>
    %cst_16 = arith.constant 2.000000e-01 : f32
    %45 = vector.broadcast %cst_16 : f32 to vector<64x128xf32>
    %46 = arith.mulf %45, %42 : vector<64x128xf32>
    %47 = arith.select %44, %42, %46 : vector<64x128xi1>, vector<64x128xf32>
    %c0_i8_17 = arith.constant 0 : i8
    %48 = vector.broadcast %c0_i8_17 : i8 to vector<64x128xi8>
    %49 = arith.cmpi ne, %10, %48 : vector<64x128xi8>
    %cst_18 = arith.constant -1.000000e+30 : f32
    %50 = vector.broadcast %cst_18 : f32 to vector<64x128xf32>
    %51 = arith.select %49, %47, %50 : vector<64x128xi1>, vector<64x128xf32>
    %cst_19 = arith.constant dense<0xFF800000> : vector<64xf32>
    %52 = vector.multi_reduction <maximumf>, %51, %cst_19 [1] : vector<64x128xf32> to vector<64xf32>
    %53 = vector.shape_cast %52 : vector<64xf32> to vector<64x1xf32>
    %54 = vector.broadcast %53 : vector<64x1xf32> to vector<64x128xf32>
    %55 = arith.subf %51, %54 : vector<64x128xf32>
    %56 = math.exp %55 : vector<64x128xf32>
    %cst_20 = arith.constant dense<0.000000e+00> : vector<64xf32>
    %57 = vector.multi_reduction <add>, %56, %cst_20 [1] : vector<64x128xf32> to vector<64xf32>
    %58 = vector.shape_cast %57 : vector<64xf32> to vector<64x1xf32>
    %59 = vector.extract_strided_slice %8 {offsets = [0, 32], sizes = [128, 32], strides = [1, 1]} : vector<128x128xf32> to vector<128x32xf32>
    %cst_21 = arith.constant dense<0.000000e+00> : vector<64x32xf32>
    %60 = tpu.matmul %56, %59, %cst_21 {dimension_numbers = #tpu.dot_dimension_numbers<[1], [0], [0], [1], [0, 0, 1, 1], [], []>} : vector<64x128xf32>, vector<128x32xf32>, vector<64x32xf32> -> vector<64x32xf32>
    %61 = tpu.reciprocal %58 {approx = true} : vector<64x1xf32> -> vector<64x1xf32>
    %62 = vector.broadcast %61 : vector<64x1xf32> to vector<64x32xf32>
    %63 = arith.mulf %60, %62 : vector<64x32xf32>
    %64 = vector.extract_strided_slice %6 {offsets = [0, 2], sizes = [64, 1], strides = [1, 1]} : vector<64x8xf32> to vector<64x1xf32>
    %65 = vector.extract_strided_slice %7 {offsets = [2, 0], sizes = [1, 128], strides = [1, 1]} : vector<8x128xf32> to vector<1x128xf32>
    %66 = vector.broadcast %64 : vector<64x1xf32> to vector<64x128xf32>
    %67 = vector.broadcast %65 : vector<1x128xf32> to vector<64x128xf32>
    %68 = arith.addf %66, %67 : vector<64x128xf32>
    %cst_22 = arith.constant 0.000000e+00 : f32
    %69 = vector.broadcast %cst_22 : f32 to vector<64x128xf32>
    %70 = arith.cmpf ogt, %68, %69 : vector<64x128xf32>
    %cst_23 = arith.constant 2.000000e-01 : f32
    %71 = vector.broadcast %cst_23 : f32 to vector<64x128xf32>
    %72 = arith.mulf %71, %68 : vector<64x128xf32>
    %73 = arith.select %70, %68, %72 : vector<64x128xi1>, vector<64x128xf32>
    %c0_i8_24 = arith.constant 0 : i8
    %74 = vector.broadcast %c0_i8_24 : i8 to vector<64x128xi8>
    %75 = arith.cmpi ne, %10, %74 : vector<64x128xi8>
    %cst_25 = arith.constant -1.000000e+30 : f32
    %76 = vector.broadcast %cst_25 : f32 to vector<64x128xf32>
    %77 = arith.select %75, %73, %76 : vector<64x128xi1>, vector<64x128xf32>
    %cst_26 = arith.constant dense<0xFF800000> : vector<64xf32>
    %78 = vector.multi_reduction <maximumf>, %77, %cst_26 [1] : vector<64x128xf32> to vector<64xf32>
    %79 = vector.shape_cast %78 : vector<64xf32> to vector<64x1xf32>
    %80 = vector.broadcast %79 : vector<64x1xf32> to vector<64x128xf32>
    %81 = arith.subf %77, %80 : vector<64x128xf32>
    %82 = math.exp %81 : vector<64x128xf32>
    %cst_27 = arith.constant dense<0.000000e+00> : vector<64xf32>
    %83 = vector.multi_reduction <add>, %82, %cst_27 [1] : vector<64x128xf32> to vector<64xf32>
    %84 = vector.shape_cast %83 : vector<64xf32> to vector<64x1xf32>
    %85 = vector.extract_strided_slice %8 {offsets = [0, 64], sizes = [128, 32], strides = [1, 1]} : vector<128x128xf32> to vector<128x32xf32>
    %cst_28 = arith.constant dense<0.000000e+00> : vector<64x32xf32>
    %86 = tpu.matmul %82, %85, %cst_28 {dimension_numbers = #tpu.dot_dimension_numbers<[1], [0], [0], [1], [0, 0, 1, 1], [], []>} : vector<64x128xf32>, vector<128x32xf32>, vector<64x32xf32> -> vector<64x32xf32>
    %87 = tpu.reciprocal %84 {approx = true} : vector<64x1xf32> -> vector<64x1xf32>
    %88 = vector.broadcast %87 : vector<64x1xf32> to vector<64x32xf32>
    %89 = arith.mulf %86, %88 : vector<64x32xf32>
    %90 = vector.extract_strided_slice %6 {offsets = [0, 3], sizes = [64, 1], strides = [1, 1]} : vector<64x8xf32> to vector<64x1xf32>
    %91 = vector.extract_strided_slice %7 {offsets = [3, 0], sizes = [1, 128], strides = [1, 1]} : vector<8x128xf32> to vector<1x128xf32>
    %92 = vector.broadcast %90 : vector<64x1xf32> to vector<64x128xf32>
    %93 = vector.broadcast %91 : vector<1x128xf32> to vector<64x128xf32>
    %94 = arith.addf %92, %93 : vector<64x128xf32>
    %cst_29 = arith.constant 0.000000e+00 : f32
    %95 = vector.broadcast %cst_29 : f32 to vector<64x128xf32>
    %96 = arith.cmpf ogt, %94, %95 : vector<64x128xf32>
    %cst_30 = arith.constant 2.000000e-01 : f32
    %97 = vector.broadcast %cst_30 : f32 to vector<64x128xf32>
    %98 = arith.mulf %97, %94 : vector<64x128xf32>
    %99 = arith.select %96, %94, %98 : vector<64x128xi1>, vector<64x128xf32>
    %c0_i8_31 = arith.constant 0 : i8
    %100 = vector.broadcast %c0_i8_31 : i8 to vector<64x128xi8>
    %101 = arith.cmpi ne, %10, %100 : vector<64x128xi8>
    %cst_32 = arith.constant -1.000000e+30 : f32
    %102 = vector.broadcast %cst_32 : f32 to vector<64x128xf32>
    %103 = arith.select %101, %99, %102 : vector<64x128xi1>, vector<64x128xf32>
    %cst_33 = arith.constant dense<0xFF800000> : vector<64xf32>
    %104 = vector.multi_reduction <maximumf>, %103, %cst_33 [1] : vector<64x128xf32> to vector<64xf32>
    %105 = vector.shape_cast %104 : vector<64xf32> to vector<64x1xf32>
    %106 = vector.broadcast %105 : vector<64x1xf32> to vector<64x128xf32>
    %107 = arith.subf %103, %106 : vector<64x128xf32>
    %108 = math.exp %107 : vector<64x128xf32>
    %cst_34 = arith.constant dense<0.000000e+00> : vector<64xf32>
    %109 = vector.multi_reduction <add>, %108, %cst_34 [1] : vector<64x128xf32> to vector<64xf32>
    %110 = vector.shape_cast %109 : vector<64xf32> to vector<64x1xf32>
    %111 = vector.extract_strided_slice %8 {offsets = [0, 96], sizes = [128, 32], strides = [1, 1]} : vector<128x128xf32> to vector<128x32xf32>
    %cst_35 = arith.constant dense<0.000000e+00> : vector<64x32xf32>
    %112 = tpu.matmul %108, %111, %cst_35 {dimension_numbers = #tpu.dot_dimension_numbers<[1], [0], [0], [1], [0, 0, 1, 1], [], []>} : vector<64x128xf32>, vector<128x32xf32>, vector<64x32xf32> -> vector<64x32xf32>
    %113 = tpu.reciprocal %110 {approx = true} : vector<64x1xf32> -> vector<64x1xf32>
    %114 = vector.broadcast %113 : vector<64x1xf32> to vector<64x32xf32>
    %115 = arith.mulf %112, %114 : vector<64x32xf32>
    %116 = tpu.concatenate %37, %63, %89, %115 in 1 : vector<64x32xf32>, vector<64x32xf32>, vector<64x32xf32>, vector<64x32xf32> -> vector<64x128xf32>
    %117 = vector.broadcast %11 : vector<1x128xf32> to vector<64x128xf32>
    %118 = arith.addf %116, %117 : vector<64x128xf32>
    %c0_36 = arith.constant 0 : index
    %c0_37 = arith.constant 0 : index
    %c0_38 = arith.constant 0 : index
    %119 = vector.load %arg8[%c0_36, %c0_37, %c0_38] : memref<1x64x128xf32, #tpu.memory_space<vmem>>, vector<1x64x128xf32>
    %120 = vector.shape_cast %119 : vector<1x64x128xf32> to vector<64x128xf32>
    %121 = vector.shape_cast %118 : vector<64x128xf32> to vector<1x64x128xf32>
    tpu.vector_store %arg8[%c0_36, %c0_37, %c0_38], %121 {strides = array<i32>} : memref<1x64x128xf32, #tpu.memory_space<vmem>>, vector<1x64x128xf32>,
    return
  }
  func.func @transform_0(%arg0: i32, %arg1: i32) -> (i32, i32, i32) {
    %c0_i32 = arith.constant 0 : i32
    %c0_i32_0 = arith.constant 0 : i32
    %c0_i32_1 = arith.constant 0 : i32
    return %arg0, %c0_i32, %c0_i32_0 : i32, i32, i32
  }
  func.func @transform_1(%arg0: i32, %arg1: i32) -> (i32, i32, i32) {
    %c0_i32 = arith.constant 0 : i32
    %c0_i32_0 = arith.constant 0 : i32
    %c0_i32_1 = arith.constant 0 : i32
    return %arg0, %c0_i32, %c0_i32_0 : i32, i32, i32
  }
  func.func @transform_2(%arg0: i32, %arg1: i32) -> (i32, i32) {
    %c0_i32 = arith.constant 0 : i32
    %c0_i32_0 = arith.constant 0 : i32
    %c0_i32_1 = arith.constant 0 : i32
    return %c0_i32, %c0_i32_0 : i32, i32
  }
  func.func @transform_3(%arg0: i32, %arg1: i32) -> (i32, i32) {
    %c0_i32 = arith.constant 0 : i32
    %c0_i32_0 = arith.constant 0 : i32
    %c0_i32_1 = arith.constant 0 : i32
    return %c0_i32, %c0_i32_0 : i32, i32
  }
  func.func @transform_4(%arg0: i32, %arg1: i32) -> (i32, i32, i32) {
    %c0_i32 = arith.constant 0 : i32
    %c0_i32_0 = arith.constant 0 : i32
    return %arg0, %arg1, %c0_i32 : i32, i32, i32
  }
  func.func @transform_5(%arg0: i32, %arg1: i32) -> (i32, i32) {
    %c0_i32 = arith.constant 0 : i32
    %c0_i32_0 = arith.constant 0 : i32
    %c0_i32_1 = arith.constant 0 : i32
    return %c0_i32, %c0_i32_0 : i32, i32
  }
  func.func @transform_6(%arg0: i32, %arg1: i32) -> (i32, i32, i32) {
    %c0_i32 = arith.constant 0 : i32
    %c0_i32_0 = arith.constant 0 : i32
    return %arg0, %arg1, %c0_i32 : i32, i32, i32
  }
}

</mosaic_0001>

<bundles_post_ra>
// kernel: tpu_custom_call.1
= control target key start
LH: loop header
LB: loop body
LE: loop exit
PB: predicated region body
PF: predicated region fallthrough
CT: control target
= control target key end

     0   :  { %11 = vsyncpa [#allocation6], 0  ;;  %s3955_s0 = inlined_call_operand.vmem [shape: f32[2,128,16], index: 0, kind: input, shape index: {}]   ;;  %s3956_s1 = inlined_call_operand.vmem [shape: f32[2,16,128], index: 1, kind: input, shape index: {}]   ;;  %s3957_s2 = inlined_call_operand.vmem [shape: f32[16,136], index: 2, kind: input, shape index: {}]   ;;  %s3958_s3 = inlined_call_operand.vmem [shape: f32[8,16], index: 3, kind: input, shape index: {}]   ;;  %s3959_s4 = inlined_call_operand.vmem [shape: s8[2,128,128], index: 4, kind: input, shape index: {}]   ;;  %s3960_s5 = inlined_call_operand.vmem [shape: f32[1,128], index: 5, kind: input, shape index: {}]   ;;  %s3961_s6 = inlined_call_operand.hbm [shape: f32[2,128,128], index: 6, kind: output, shape index: {}]  }
   0x1   :  { %13 = vsyncpa [#allocation6 + $0x1], 0  ;;  %s2903_s21 = smov 0   ;;  %s2905_s22 = smov 0  }
   0x2   :  { %s2907_s23 = smov 0   ;;  %s2909_s24 = smov 0  }
   0x3   :  { %s2911_s25 = smov 0   ;;  %s2913_s26 = smov 0  }
   0x4   :  { %s2915_s27 = smov 0   ;;  %s2917_s28 = smov 0  }
   0x5 LB: > { %3969 = sst [smem:[#allocation8_spill]] %s2834_s23  ;;  %s2206_s29 = sadd.s32 4294967295, %s2854_s28   ;;  %s2854_s28 = sphi %s2917_s28, %s19_s28   ;;  %s2850_s27 = sphi %s2915_s27, %s4006_s27   ;;  %s2846_s26 = sphi %s2913_s26, %s4002_s26   ;;  %s2842_s25 = sphi %s2911_s25, %s4001_s25   ;;  %s2838_s24 = sphi %s2909_s24, %s4000_s24   ;;  %s2834_s23 = sphi %s2907_s23, %s3999_s23   ;;  %s2830_s22 = sphi %s2905_s22, %s4005_s22   ;;  %s2826_s21 = sphi %s2903_s21, %s4004_s21  }
   0x6   : > { %3970 = sst [smem:[#allocation9_spill]] %s2846_s26  ;;  %s2207_s30 = sadd.s32 4294967294, %s2854_s28  }
   0x7   : > { %3971 = sst [smem:[#allocation10_spill]] %s2850_s27  ;;  %s28_s7 = sadd.s32 1, %s2846_s26 }
   0x8   : > { %p29_p0 = scmp.ge.s32.totalorder %s28_s7, 2  ;;  %s31_s8 = sadd.s32 1, %s2850_s27 }
   0x9   : > { %p193_p1 = scmp.ne.s32.totalorder %s2834_s23, %s2830_s22  ;;  %p194_p2 = scmp.eq.s32.totalorder %s2206_s29, 3 }
   0xa   : > { %s4008_s7 = smov (%p29_p0, %s28_s7), 0  ;;  %s4010_s8 = smov (!%p29_p0, %s31_s8), %s2850_s27 }
   0xb   : > { %3972 = sst [smem:[#allocation11_spill]] %s4008_s7  ;;  %s179_s9 = ssub.s32 %s2846_s26, %s4008_s7 }
   0xc   : > { %p2954_p3 = por %p194_p2, %p193_p1  ;;  %p33_p4 = scmp.ge.s32.totalorder %s4010_s8, 2 }
   0xd   : > { %p199_p5 = scmp.ne.s32.totalorder %s2830_s22, %s2826_s21  ;;  %p200_p6 = scmp.eq.s32.totalorder %s2207_s30, 3 }
   0xe   : > { %p2210_p7 = scmp.ge.s32.totalorder %s2854_s28, 1  ;;  %s4012_s8 = smov (%p33_p4, %s4010_s8), 0 }
   0xf   : > { %3974 = sst [smem:[#allocation12_spill]] %s4012_s8  ;;  %p2963_p8 = por %p200_p6, %p199_p5 }
  0x10   : > { %p256_p9 = scmp.lt.s32.totalorder %s2854_s28, 5  ;;  %s178_s12 = ssub.s32 %s2850_s27, %s4012_s8 }
  0x11   : > { %s3975_s11 = scalar_select %p2963_p8, 1, 0 }
  0x12   : > { %s183_s13 = sadd.s32 1, %s2834_s23  ;;  %s180_s14 = sor.u32 %s179_s9, %s178_s12 }
  0x13   : > { %3976 = sst [smem:[#allocation13_spill]] %s3975_s11  ;;  %p257_p10 = pnand %p2210_p7, %p256_p9 }
  0x14   : > { %p181_p11 = scmp.eq.s32.totalorder %s180_s14, 0 }
  0x15   : > { %260 = sbr.rel (%p257_p10) target bundleno = 1422 (0x58e), region = 44 }
  0x16   : > { %s2972_s15 = scalar_select %p181_p11, %s2834_s23, %s183_s13  }
  0x18   : > { %3977 = sst [smem:[#allocation14_spill]] %s2972_s15 }
  0x1a   : > { %s3966_s16 = sand.u32 1, %s2830_s22   ;;  %p300_p12 = scmp.lt.s32.totalorder %s2842_s25, 1 }
  0x1b   : > { %s2211_s17 = sshll.u32 %s3966_s16, 6  ;;  %s2216_s18 = sshll.u32 %s2838_s24, 1 }
  0x1c   : > { %p313_p13 = scmp.lt.s32.totalorder %s2216_s18, 3  ;;  %s2995_s11 = scalar_lea.vmem [#allocation5], %s2211_s17 }
  0x1d   : > { %s301_s19 = scalar_select %p300_p12, %s2842_s25, 1 }
  0x1e   : > { %s4014_s18 = smov (!%p313_p13, %s2216_s18), 3  ;;  %p2219_p0 = scmp.ne.s32.totalorder %s2838_s24, 0 }
  0x1f   : > { %s2245_s20 = sshll.u32 %s301_s19, 7  ;;  %s2246_s29 = sshll.u32 %s301_s19, 4 }
  0x20   : > { %s2983_s12 = scalar_lea.vmem %s3955_s0, %s2245_s20  ;;  %s2988_s8 = scalar_lea.vmem %s3956_s1, %s2246_s29 }
  0x21   : > { %s2217_s7 = sshll.u32 %s301_s19, 2  ;;  %326 = sbr.rel (%p2219_p0) target bundleno = 271 (0x10f), region = 48 }
  0x22   : > { %s316_s27 = sadd.s32 %s2217_s7, %s4014_s18 }
  0x23   : > { %s2218_s26 = sshll.u32 %s316_s27, 3 }
  0x24   : > { %s2993_s23 = scalar_lea.vmem %s3959_s4, %s2218_s26 }
  0x26   : > { %v346_v0 = vld [vmem:[%s3957_s2 + $0x18] sm:$0xff]  ;;  %v345_v1 = vld [vmem:[%s3957_s2 + $0x10] sm:$0xff]  ;;  %v344_v2 = vld [vmem:[%s3957_s2 + $0x8] sm:$0xff]  ;;  %v2856_v4 = vmov 0.0   ;;  %vm347_vm0 = vcmask 130048   ;;  %vm2857_vm1 = vmmov 0  }
  0x27   : > { %424 = vmatprep.subr.mxu0 %v346_v0  ;;  %2529 = vmatprep.subr.mxu1 %v346_v0  ;;  %v343_v3 = vld [vmem:[%s3957_s2] sm:$0xff]  ;;  %v336_v6 = vld [vmem:[%s2983_s12 + $0x48] sm:$0xff]  ;;  %v337_v10 = vld [vmem:[%s2983_s12 + $0x50] sm:$0xff]  ;;  %vm573_vm2 = vcmask 64512  }
  0x28   : > { %425 = vmatpush1.msra.mxu0 %v345_v1  ;;  %460 = vmatprep.mubr.f32.mxu0 %v2856_v4  ;;  %v327_v5 = vld [vmem:[%s2983_s12] sm:$0xff]  ;;  %v592_v7 = vld [vmem:[%s2988_s8 + $0x8] sm:$0xff]  ;;  %v329_v11 = vld [vmem:[%s2983_s12 + $0x10] sm:$0xff] }
  0x29   : > { %426 = vmatprep.subr.mxu0 %v344_v2  ;;  %2531 = vmatpush1.msra.mxu1 %v345_v1  ;;  %v328_v8 = vld [vmem:[%s2983_s12 + $0x8] sm:$0xff]  ;;  %v591_v9 = vld [vmem:[%s2988_s8] sm:$0xff]  ;;  %v338_v12 = vld [vmem:[%s2983_s12 + $0x58] sm:$0xff] }
  0x2a   : > { %427 = vmatpush1.msra.mxu0 %v343_v3  ;;  %2530 = vmatprep.subr.mxu1 %v344_v2  ;;  %v330_v13 = vld [vmem:[%s2983_s12 + $0x18] sm:$0xff]  ;;  %v339_v14 = vld [vmem:[%s2983_s12 + $0x60] sm:$0xff]  ;;  %v340_v16 = vld [vmem:[%s2983_s12 + $0x68] sm:$0xff] }
  0x2b   : > { %2220 = vmatmul.mubr.msk.f32.vlgmr.msra.gmra.mxu0 %vm347_vm0, %v327_v5  ;;  %2532 = vmatpush1.msra.mxu1 %v343_v3  ;;  %v331_v15 = vld [vmem:[%s2983_s12 + $0x20] sm:$0xff]  ;;  %v332_v17 = vld [vmem:[%s2983_s12 + $0x28] sm:$0xff]  ;;  %v341_v18 = vld [vmem:[%s2983_s12 + $0x70] sm:$0xff] }
  0x2c   : > { %514 = vmatprep.mubr.f32.mxu1 %v2856_v4  ;;  %466 = vmatprep.mubr.f32.mxu0 %v2856_v4  ;;  %v333_v19 = vld [vmem:[%s2983_s12 + $0x30] sm:$0xff]  ;;  %v342_v20 = vld [vmem:[%s2983_s12 + $0x78] sm:$0xff]  ;;  %v590_v22 = vld [vmem:[%s3958_s3] sm:$0xff] }
  0x2d   : > { %2229 = vmatmul.mubr.msk.f32.vlgmr.msra.gmra.mxu1 %vm347_vm0, %v336_v6  ;;  %2346 = vmatprep.subr.mxu1 %v2856_v4  ;;  %v334_v21 = vld [vmem:[%s2983_s12 + $0x38] sm:$0xff]  ;;  %v335_v23 = vld [vmem:[%s2983_s12 + $0x40] sm:$0xff] }
  0x2e   : > { %2347 = vmatpush3.msra.mxu1 %v592_v7  ;;  %520 = vmatprep.mubr.f32.mxu1 %v2856_v4 }
  0x2f   : > { %2221 = vmatmul.mubr.msk.f32.gmra.mxu0 %vm347_vm0, %v328_v8  ;;  %2348 = vmatprep.subr.mxu1 %v2856_v4 }
  0x30   : > { %472 = vmatprep.mubr.f32.mxu0 %v2856_v4  ;;  %2349 = vmatpush3.msra.mxu1 %v591_v9 }
  0x31   : > { %2230 = vmatmul.mubr.msk.f32.gmra.mxu1 %vm347_vm0, %v337_v10 }
  0x32   : > { %526 = vmatprep.mubr.f32.mxu1 %v2856_v4 }
  0x33   : > { %2222 = vmatmul.mubr.msk.f32.gmra.mxu0 %vm347_vm0, %v329_v11 }
  0x34   : > { %478 = vmatprep.mubr.f32.mxu0 %v2856_v4 }
  0x35   : > { %2231 = vmatmul.mubr.msk.f32.gmra.mxu1 %vm347_vm0, %v338_v12 }
  0x36   : > { %532 = vmatprep.mubr.f32.mxu1 %v2856_v4 }
  0x37   : > { %2223 = vmatmul.mubr.msk.f32.gmra.mxu0 %vm347_vm0, %v330_v13 }
  0x38   : > { %484 = vmatprep.mubr.f32.mxu0 %v2856_v4 }
  0x39   : > { %2232 = vmatmul.mubr.msk.f32.gmra.mxu1 %vm347_vm0, %v339_v14 }
  0x3a   : > { %538 = vmatprep.mubr.f32.mxu1 %v2856_v4 }
  0x3b   : > { %2224 = vmatmul.mubr.msk.f32.gmra.mxu0 %vm347_vm0, %v331_v15 }
  0x3c   : > { %490 = vmatprep.mubr.f32.mxu0 %v2856_v4 }
  0x3d   : > { %2233 = vmatmul.mubr.msk.f32.gmra.mxu1 %vm347_vm0, %v340_v16 }
  0x3e   : > { %544 = vmatprep.mubr.f32.mxu1 %v2856_v4 }
  0x3f   : > { %2225 = vmatmul.mubr.msk.f32.gmra.mxu0 %vm347_vm0, %v332_v17 }
  0x40   : > { %496 = vmatprep.mubr.f32.mxu0 %v2856_v4 }
  0x41   : > { %2234 = vmatmul.mubr.msk.f32.gmra.mxu1 %vm347_vm0, %v341_v18 }
  0x42   : > { %550 = vmatprep.mubr.f32.mxu1 %v2856_v4 }
  0x43   : > { %2226 = vmatmul.mubr.msk.f32.gmra.mxu0 %vm347_vm0, %v333_v19 }
  0x44   : > { %502 = vmatprep.mubr.f32.mxu0 %v2856_v4 }
  0x45   : > { %2235 = vmatmul.mubr.msk.f32.gmra.mxu1 %vm347_vm0, %v342_v20 }
  0x46   : > { %2350 = vmatprep.mubr.msk.f32.mxu1 %vm2857_vm1, %v2856_v4 }
  0x47   : > { %2227 = vmatmul.mubr.msk.f32.gmra.mxu0 %vm347_vm0, %v334_v21 }
  0x48   : > { %508 = vmatprep.mubr.f32.mxu0 %v2856_v4 }
  0x49   : > { %2351 = vmatmul.mubr.msk.f32.vlgmr.msra.gmra.mxu1 %vm347_vm0, %v590_v22 }
  0x4b   : > { %2228 = vmatmul.mubr.msk.f32.gmra.mxu0 %vm347_vm0, %v335_v23 }
  0xeb   : > { %v462_v24 = vpop.f32.mrf.mxu0 }
  0xec   : > { %557 = vst [vmem:[#allocation2 + $0x30] sm:$0xff] %v462_v24 }
  0xed   : > { %v464_v25 = vpop.f32.mrf.mxu0  ;;  %v516_v26 = vpop.f32.mrf.mxu1 }
  0xee   : > { %574 = vst.msk [vmem:[#allocation4] sm:$0xff] %vm573_vm2, %v464_v25  ;;  %566 = vst [vmem:[#allocation2 + $0x20] sm:$0xff] %v516_v26 }
  0xef   : > { %v468_v27 = vpop.f32.mrf.mxu0  ;;  %v518_v28 = vpop.f32.mrf.mxu1 }
  0xf0   : > { %558 = vst [vmem:[#allocation2] sm:$0xff] %v468_v27  ;;  %583 = vst.msk [vmem:[#allocation4 + $0x48] sm:$0xff] %vm573_vm2, %v518_v28 }
  0xf1   : > { %v470_v29 = vpop.f32.mrf.mxu0  ;;  %v522_v30 = vpop.f32.mrf.mxu1 }
  0xf2   : > { %575 = vst.msk [vmem:[#allocation4 + $0x8] sm:$0xff] %vm573_vm2, %v470_v29  ;;  %567 = vst [vmem:[#allocation2 + $0x10] sm:$0xff] %v522_v30 }
  0xf3   : > { %v474_v31 = vpop.f32.mrf.mxu0  ;;  %v524_v32 = vpop.f32.mrf.mxu1 }
  0xf4   : > { %559 = vst [vmem:[#allocation2 + $0x58] sm:$0xff] %v474_v31  ;;  %584 = vst.msk [vmem:[#allocation4 + $0x50] sm:$0xff] %vm573_vm2, %v524_v32 }
  0xf5   : > { %v476_v33 = vpop.f32.mrf.mxu0  ;;  %v528_v34 = vpop.f32.mrf.mxu1 }
  0xf6   : > { %576 = vst.msk [vmem:[#allocation4 + $0x10] sm:$0xff] %vm573_vm2, %v476_v33  ;;  %568 = vst [vmem:[#allocation2 + $0x38] sm:$0xff] %v528_v34 }
  0xf7   : > { %v480_v35 = vpop.f32.mrf.mxu0  ;;  %v530_v36 = vpop.f32.mrf.mxu1 }
  0xf8   : > { %560 = vst [vmem:[#allocation2 + $0x18] sm:$0xff] %v480_v35  ;;  %585 = vst.msk [vmem:[#allocation4 + $0x58] sm:$0xff] %vm573_vm2, %v530_v36 }
  0xf9   : > { %v482_v37 = vpop.f32.mrf.mxu0  ;;  %v534_v38 = vpop.f32.mrf.mxu1 }
  0xfa   : > { %577 = vst.msk [vmem:[#allocation4 + $0x18] sm:$0xff] %vm573_vm2, %v482_v37  ;;  %569 = vst [vmem:[#allocation2 + $0x60] sm:$0xff] %v534_v38 }
  0xfb   : > { %v486_v39 = vpop.f32.mrf.mxu0  ;;  %v536_v40 = vpop.f32.mrf.mxu1 }
  0xfc   : > { %561 = vst [vmem:[#allocation2 + $0x50] sm:$0xff] %v486_v39  ;;  %586 = vst.msk [vmem:[#allocation4 + $0x60] sm:$0xff] %vm573_vm2, %v536_v40 }
  0xfd   : > { %v488_v41 = vpop.f32.mrf.mxu0  ;;  %v540_v42 = vpop.f32.mrf.mxu1 }
  0xfe   : > { %578 = vst.msk [vmem:[#allocation4 + $0x20] sm:$0xff] %vm573_vm2, %v488_v41  ;;  %570 = vst [vmem:[#allocation2 + $0x70] sm:$0xff] %v540_v42 }
  0xff   : > { %v492_v43 = vpop.f32.mrf.mxu0  ;;  %v542_v44 = vpop.f32.mrf.mxu1 }
 0x100   : > { %562 = vst [vmem:[#allocation2 + $0x68] sm:$0xff] %v492_v43  ;;  %587 = vst.msk [vmem:[#allocation4 + $0x68] sm:$0xff] %vm573_vm2, %v542_v44 }
 0x101   : > { %v494_v45 = vpop.f32.mrf.mxu0  ;;  %v546_v46 = vpop.f32.mrf.mxu1 }
 0x102   : > { %579 = vst.msk [vmem:[#allocation4 + $0x28] sm:$0xff] %vm573_vm2, %v494_v45  ;;  %571 = vst [vmem:[#allocation2 + $0x78] sm:$0xff] %v546_v46 }
 0x103   : > { %v498_v47 = vpop.f32.mrf.mxu0  ;;  %v548_v48 = vpop.f32.mrf.mxu1 }
 0x104   : > { %563 = vst [vmem:[#allocation2 + $0x8] sm:$0xff] %v498_v47  ;;  %588 = vst.msk [vmem:[#allocation4 + $0x70] sm:$0xff] %vm573_vm2, %v548_v48 }
 0x105   : > { %v500_v49 = vpop.f32.mrf.mxu0  ;;  %v552_v50 = vpop.f32.mrf.mxu1 }
 0x106   : > { %580 = vst.msk [vmem:[#allocation4 + $0x30] sm:$0xff] %vm573_vm2, %v500_v49  ;;  %572 = vst [vmem:[#allocation2 + $0x28] sm:$0xff] %v552_v50 }
 0x107   : > { %v504_v51 = vpop.f32.mrf.mxu0  ;;  %v554_v52 = vpop.f32.mrf.mxu1 }
 0x108   : > { %564 = vst [vmem:[#allocation2 + $0x48] sm:$0xff] %v504_v51  ;;  %589 = vst.msk [vmem:[#allocation4 + $0x78] sm:$0xff] %vm573_vm2, %v554_v52 }
 0x109   : > { %v506_v53 = vpop.f32.mrf.mxu0  ;;  %v662_v54 = vpop.f32.mrf.mxu1 }
 0x10a   : > { %581 = vst.msk [vmem:[#allocation4 + $0x38] sm:$0xff] %vm573_vm2, %v506_v53  ;;  %666 = vst [vmem:[#allocation3] sm:$0xff] %v662_v54 }
 0x10b   : > { %v510_v55 = vpop.f32.mrf.mxu0  ;;  %v2352_v56 = vpop.f32.mrf.mxu1 }
 0x10c   : > { %565 = vst [vmem:[#allocation2 + $0x40] sm:$0xff] %v510_v55 }
 0x10d   : > { %v512_v57 = vpop.f32.mrf.mxu0 }
 0x10e   : > { %582 = vst.msk [vmem:[#allocation4 + $0x40] sm:$0xff] %vm573_vm2, %v512_v57 }
 0x10f PF: > { %s2237_s17 = sshll.u32 %s2838_s24, 6  ;;  %v2858_v58 = vmov 0   ;;  %v3067_v59 = vld [vmem:[#allocation2 + $0x28] sm:$0xff]  ;;  %v694_v60 = vld [vmem:[%s2993_s23] sm:$0xff]  ;;  %v2859_v19 = vmov 1   ;;  %v2860_v20 = vmov 2   ;;  %v737_v24 = vlaneseq }
 0x110   : > { %2616 = vset.pattern.permute.xlu1 %v2858_v58  ;;  %2615 = vset.pattern.permute.xlu0 %v2858_v58  ;;  %s668_s18 = scalar_lea.vmem [#allocation4], %s2237_s17  ;;  %vm773_vm3 = vnez %v694_v60  ;;  %v695_v4 = vld [vmem:[%s2993_s23 + $0x8] sm:$0xff]  ;;  %v2861_v22 = vmov 3   ;;  %v3118_v23 = vld [vmem:[#allocation2 + $0x78] sm:$0xff]  ;;  %v3125_v25 = vld [vmem:[#allocation2 + $0x70] sm:$0xff]  ;;  %s2862_s23 = smov 96  }
 0x111   : > { %2353 = vmatprep.subr.mxu0 %v3067_v59  ;;  %v3078_v63 = vsel %vm773_vm3, 16843009, %v2858_v58  ;;  %vm774_vm4 = vnez %v695_v4  ;;  %v3128_v26 = vld [vmem:[#allocation2 + $0x60] sm:$0xff]  ;;  %v3131_v27 = vshrl.u32 %v737_v24, 7  ;;  %v3134_v28 = vld [vmem:[#allocation2 + $0x38] sm:$0xff]  ;;  %v3141_v31 = vld [vmem:[#allocation2 + $0x10] sm:$0xff] }
 0x112   : > { %v779_v2 = vunpack.c.2.s8 %v3078_v63  ;;  %v780_v3 = vunpack.c.3.s8 %v3078_v63  ;;  %2354 = vmatpush3.msra.mxu0 %v3067_v59  ;;  %v3097_v11 = vsel %vm774_vm4, 16843009, %v2858_v58  ;;  %v3139_v30 = vld [vmem:[#allocation3] sm:$0xff]  ;;  %v3159_v36 = vld [vmem:[#allocation2 + $0x48] sm:$0xff]  ;;  %v777_v40 = vunpack.c.0.s8 %v3078_v63  ;;  %v3195_v41 = vld [vmem:[#allocation2 + $0x50] sm:$0xff]  ;;  %s2863_s9 = smov 32  }
 0x113   : > { %v784_v16 = vunpack.c.3.s8 %v3097_v11  ;;  %2355 = vmatprep.subr.mxu0 %v3118_v23  ;;  %v1369_v29 = vsub.s32 2, %v3131_v27  ;;  %v3149_v33 = vld [vmem:[#allocation2 + $0x20] sm:$0xff]  ;;  %v1670_v35 = vsub.s32 3, %v3131_v27  ;;  %v3167_v38 = vld [vmem:[#allocation2 + $0x8] sm:$0xff]  ;;  %v3199_v42 = vld [vmem:[#allocation2 + $0x18] sm:$0xff]  ;;  %v778_v44 = vunpack.c.1.s8 %v3078_v63  ;;  %s2864_s12 = smov 64  }
 0x114   : > { %v789_v5 = vpack.c.b16 %v779_v2, %v779_v2  ;;  %v791_v6 = vpack.c.b16 %v780_v3, %v780_v3  ;;  %2356 = vmatpush3.msra.mxu0 %v3118_v23  ;;  %v3153_v34 = vld [vmem:[#allocation2 + $0x40] sm:$0xff]  ;;  %v3174_v39 = vld [vmem:[#allocation2 + $0x68] sm:$0xff]  ;;  %v785_v43 = vpack.c.b16 %v777_v40, %v777_v40  ;;  %v739_v47 = vsub.s32 0, %v3131_v27  ;;  %s2240_s20 = sshll.u32 %s2838_s24, 3  ;;  %s2241_s30 = sshll.u32 %s2842_s25, 4 }
 0x115   : > { %v3070_v61 = vld [vmem:[%s668_s18 + $0x10] sm:$0xff]  ;;  %v3072_v62 = vld [vmem:[%s668_s18] sm:$0xff]  ;;  %v3080_v0 = vld [vmem:[%s668_s18 + $0x18] sm:$0xff]  ;;  %v799_v17 = vpack.c.b16 %v784_v16, %v784_v16  ;;  %2357 = vmatprep.subr.mxu0 %v3125_v25  ;;  %v3145_v32 = vrot.slane %v3139_v30, %v1369_v29  ;;  %v3162_v37 = vrot.slane %v3139_v30, %v1670_v35  ;;  %v787_v46 = vpack.c.b16 %v778_v44, %v778_v44  ;;  %s2095_s24 = sadd.s32 %s2241_s30, %s2240_s20  ;;  %s2098_s29 = sshll.u32 %s2995_s11, 4  ;;  %s3897_s29 = int_to_ptr.vmem [resolvable:$true] %s2098_s29 }
 0x116   : > { %709 = vperm.xlu1 %2616, %v3070_v61   ;;  %699 = vperm.xlu0 %2615, %v3072_v62   ;;  %v3082_v1 = vld [vmem:[%s668_s18 + $0x8] sm:$0xff]  ;;  %v3092_v8 = vld [vmem:[%s668_s18 + $0x20] sm:$0xff]  ;;  %v790_v9 = vpack.c.b8 %v789_v5, %v789_v5  ;;  %v792_v10 = vpack.c.b8 %v791_v6, %v791_v6  ;;  %v3099_v12 = vld [vmem:[%s668_s18 + $0x38] sm:$0xff]  ;;  %v786_v45 = vpack.c.b8 %v785_v43, %v785_v43  ;;  %v783_v49 = vunpack.c.2.s8 %v3097_v11  ;;  %s2242_s25 = sshll.u32 %s2095_s24, 7  ;;  %s3996_s26 = sand.u32 1, %s2830_s22  }
 0x117   : > { %v3090_v7 = vld [vmem:[%s668_s18 + $0x28] sm:$0xff]  ;;  %v675_v13 = vld [vmem:[%s668_s18 + $0x30] sm:$0xff]  ;;  %v800_v18 = vpack.c.b8 %v799_v17, %v799_v17  ;;  %2358 = vmatpush3.msra.mxu0 %v3125_v25  ;;  %v788_v48 = vpack.c.b8 %v787_v46, %v787_v46  ;;  %v3211_v51 = vrot.slane %v3139_v30, %v739_v47  ;;  %s3895_s7 = scalar_lea.hbm %s3961_s6, %s2242_s25  ;;  %s3904_s15 = scalar_lea.sflag [#allocation6], %s3996_s26 }
 0x118   : > { %vm803_vm5 = vnez %v790_v9  ;;  %vm804_vm6 = vnez %v792_v10  ;;  %2359 = vmatprep.subr.mxu0 %v3128_v26  ;;  %vm801_vm8 = vnez %v786_v45  ;;  %v797_v52 = vpack.c.b16 %v783_v49, %v783_v49  ;;  %s2762_s8 = scalar_lea.vmem %s3897_s29, 1024  ;;  %s2865_s16 = smov [#allocation5]  }
 0x119   : > { %v3102_v14 = vsel %vm803_vm5, 16843009, %v2858_v58  ;;  %v3105_v15 = vsel %vm804_vm6, 16843009, %v2858_v58  ;;  %vm808_vm7 = vnez %v800_v18  ;;  %2360 = vmatpush3.msra.mxu0 %v3128_v26  ;;  %v809_v50 = vsel %vm801_vm8, 16843009, %v2858_v58  ;;  %p2763_p1 = scmp.ne.s32.totalorder %s3897_s29, %s2762_s8 }
 0x11a   : > { %714 = vperm.xlu1 %2616, %v3080_v0   ;;  %704 = vperm.xlu0 %2615, %v3082_v1   ;;  %v3113_v21 = vsel %vm808_vm7, 16843009, %v2858_v58  ;;  %vm802_vm9 = vnez %v788_v48  ;;  %v817_v53 = vunpack.c.0.s8 %v809_v50  ;;  %v798_v60 = vpack.c.b8 %v797_v52, %v797_v52  ;;  %s2766_s17 = sshll.u32 %s2865_s16, 4  ;;  %s2767_s17 = int_to_ptr.vmem [resolvable:$false] %s2766_s17 }
 0x11b   : > { %2361 = vmatprep.subr.mxu0 %v3134_v28  ;;  %v810_v56 = vsel %vm802_vm9, 16843009, %v2858_v58  ;;  %p2764_p2 = pnand %p2763_p1, %p2954_p3  ;;  %s2768_s18 = scalar_lea.vmem %s2767_s17, 2048 }
 0x11c   : > { %2362 = vmatpush3.msra.mxu0 %v3134_v28  ;;  %vm3217_vm11 = vcmp.ne.s32.totalorder %v817_v53, 0  ;;  %v818_v63 = vunpack.c.0.s8 %v810_v56  ;;  %vm807_vm12 = vnez %v798_v60  ;;  %v3270_v53 = vld [vmem:[#allocation2 + $0x58] sm:$0xff]  ;;  %v3278_v56 = vld [vmem:[#allocation2] sm:$0xff]  ;;  %p2769_p5 = scmp.lt.s32.totalorder %s3897_s29, %s2767_s17  ;;  %p2770_p6 = scmp.lt.s32.totalorder %s2768_s18, %s2762_s8 }
 0x11d   : > { %2363 = vmatprep.subr.mxu0 %v3141_v31  ;;  %v815_v9 = vsel %vm807_vm12, 16843009, %v2858_v58  ;;  %p2765_p4 = pneg %p2764_p2 }
 0x11e   : > { %724 = vperm.xlu1 %2616, %v3090_v7   ;;  %719 = vperm.xlu0 %2615, %v3092_v8   ;;  %vm3229_vm14 = vcmp.ne.s32.totalorder %v818_v63, 0  ;;  %v823_v16 = vunpack.c.0.s8 %v815_v9  ;;  %p2771_p7 = por %p2770_p6, %p2769_p5 }
 0x11f   : > { %2364 = vmatpush3.msra.mxu0 %v3141_v31 }
 0x120   : > { %2365 = vmatprep.subr.mxu0 %v3149_v33  ;;  %vm3250_vm0 = vcmp.ne.s32.totalorder %v823_v16, 0  ;;  %p2772_p9 = pnand %p2771_p7, %p2765_p4 }
 0x121   : > { %2366 = vmatpush3.msra.mxu0 %v3149_v33 }
 0x122   : > { %734 = vperm.xlu1 %2616, %v3099_v12   ;;  %729 = vperm.xlu0 %2615, %v675_v13  }
 0x123   : > { %2367 = vmatprep.subr.mxu0 %v3153_v34 }
 0x124   : > { %2368 = vmatpush3.msra.mxu0 %v3153_v34 }
 0x125   : > { %2369 = vmatprep.subr.mxu0 %v3159_v36 }
 0x126   : > { %2617 = vset.pattern.permute.xlu1 %v2859_v19  ;;  %2618 = vset.pattern.permute.xlu0 %v2860_v20 }
 0x127   : > { %1019 = vperm.xlu1 %2617, %v3072_v62   ;;  %1336 = vperm.xlu0 %2618, %v3072_v62  }
 0x128   : > { %2370 = vmatpush3.msra.mxu0 %v3159_v36 }
 0x129   : > { %2371 = vmatprep.subr.mxu0 %v3167_v38 }
 0x12a   : > { %2372 = vmatpush3.msra.mxu0 %v3167_v38 }
 0x12b   : > { %1023 = vperm.xlu1 %2617, %v3082_v1   ;;  %1360 = vperm.xlu0 %2618, %v675_v13  }
 0x12c   : > { %2373 = vmatprep.subr.mxu0 %v3174_v39 }
 0x12d   : > { %2374 = vmatpush3.msra.mxu0 %v3174_v39 }
 0x12e   : > { %2375 = vmatprep.subr.mxu0 %v3195_v41 }
 0x12f   : > { %1027 = vperm.xlu1 %2617, %v3070_v61   ;;  %2626 = vset.pattern.permute.xlu0 %v2861_v22 }
 0x130   : > { %1661 = vperm.xlu0 %2626, %v675_v13   ;;  %2376 = vmatpush3.msra.mxu0 %v3195_v41 }
 0x131   : > { %2377 = vmatprep.subr.mxu0 %v3199_v42 }
 0x132   : > { %2378 = vmatpush3.msra.mxu0 %v3199_v42 }
 0x133   : > { %1031 = vperm.xlu1 %2617, %v3080_v0   ;;  %2379 = vmatprep.subr.mxu0 %v3270_v53 }
 0x134   : > { %2380 = vmatpush3.msra.mxu0 %v3270_v53 }
 0x135   : > { %2381 = vmatprep.subr.mxu0 %v3278_v56 }
 0x136   : > { %2382 = vmatpush3.msra.mxu0 %v3278_v56 }
 0x137   : > { %1035 = vperm.xlu1 %2617, %v3092_v8  }
 0x13b   : > { %1039 = vperm.xlu1 %2617, %v3090_v7  }
 0x13f   : > { %1043 = vperm.xlu1 %2617, %v675_v13   ;;  %v1052_v13 = vsub.s32 1, %v3131_v27 }
 0x143   : > { %1047 = vperm.xlu1 %2617, %v3099_v12  }
 0x147   : > { %2619 = vset.pattern.permute.xlu1 %v2860_v20 }
 0x148   : > { %1340 = vperm.xlu1 %2619, %v3082_v1  }
 0x14c   : > { %2620 = vset.pattern.permute.xlu1 %v2861_v22 }
 0x14d   : > { %1637 = vperm.xlu1 %2620, %v3072_v62  }
 0x151   : > { %1641 = vperm.xlu1 %2620, %v3082_v1  }
 0x155   : > { %2621 = vset.pattern.permute.xlu1 %v2860_v20 }
 0x156   : > { %1344 = vperm.xlu1 %2621, %v3070_v61  }
 0x15a   : > { %1348 = vperm.xlu1 %2621, %v3080_v0  }
 0x15e   : > { %2622 = vset.pattern.permute.xlu1 %v2861_v22 }
 0x15f   : > { %1645 = vperm.xlu1 %2622, %v3070_v61  }
 0x163   : > { %1649 = vperm.xlu1 %2622, %v3080_v0  }
 0x167   : > { %2623 = vset.pattern.permute.xlu1 %v2860_v20 }
 0x168   : > { %1352 = vperm.xlu1 %2623, %v3092_v8  }
 0x16c   : > { %1356 = vperm.xlu1 %2623, %v3090_v7  }
 0x170   : > { %2624 = vset.pattern.permute.xlu1 %v2861_v22 }
 0x171   : > { %1653 = vperm.xlu1 %2624, %v3092_v8  }
 0x175   : > { %1657 = vperm.xlu1 %2624, %v3090_v7  }
 0x179   : > { %2625 = vset.pattern.permute.xlu1 %v2860_v20  ;;  %v3248_v20 = vrot.slane %v3139_v30, %v1052_v13 }
 0x17a   : > { %1364 = vperm.xlu1 %2625, %v3099_v12  }
 0x17e   : > { %2627 = vset.pattern.permute.xlu1 %v2861_v22 }
 0x17f   : > { %1665 = vperm.xlu1 %2627, %v3099_v12  }
 0x183   : > { %1196 = vrot.lane.b32.xlu1 %v3067_v59, %s2862_s23 }
 0x191   : > { %v3213_v54 = vpop.permute.xlu1 %709  ;;  %v700_v55 = vpop.permute.xlu0 %699 }
 0x192   : > { %v741_v57 = vadd.f32 %v3211_v51, %v700_v55 }
 0x194   : > { %vm749_vm10 = vcmp.gt.f32.partialorder %v741_v57, 0.0  ;;  %v757_v61 = vmul.f32 0.2, %v741_v57 }
 0x195   : > { %v3221_v0 = vpop.permute.xlu1 %714  ;;  %v705_v1 = vpop.permute.xlu0 %704 }
 0x196   : > { %v742_v2 = vadd.f32 %v3211_v51, %v705_v1  ;;  %v765_v3 = vsel %vm749_vm10, %v741_v57, %v757_v61  ;;  %v3282_v57 = vld [vmem:[#allocation2 + $0x30] sm:$0xff] }
 0x197   : > { %v3226_v4 = vsel %vm3217_vm11, %v765_v3, -1e+30  ;;  %2383 = vmatprep.subr.mxu0 %v3282_v57 }
 0x198   : > { %841 = vmax.xlane.f32.xlu0 %v3226_v4  ;;  %vm750_vm13 = vcmp.gt.f32.partialorder %v742_v2, 0.0  ;;  %v758_v5 = vmul.f32 0.2, %v742_v2  ;;  %2384 = vmatpush3.msra.mxu0 %v3282_v57 }
 0x199   : > { %v3233_v7 = vpop.permute.xlu1 %724  ;;  %v3235_v8 = vpop.permute.xlu0 %719 }
 0x19a   : > { %v766_v10 = vsel %vm750_vm13, %v742_v2, %v758_v5 }
 0x19b   : > { %v3240_v12 = vsel %vm3229_vm14, %v766_v10, -1e+30 }
 0x19c   : > { %843 = vmax.xlane.f32.xlu0 %v3240_v12 }
 0x19d   : > { %v3244_v17 = vpop.permute.xlu1 %734  ;;  %v730_v18 = vpop.permute.xlu0 %729 }
 0x19e   : > { %v747_v19 = vadd.f32 %v3211_v51, %v730_v18 }
 0x1a0   : > { %vm755_vm15 = vcmp.gt.f32.partialorder %v747_v19, 0.0  ;;  %v763_v22 = vmul.f32 0.2, %v747_v19 }
 0x1a2   : > { %v1020_v29 = vpop.permute.xlu1 %1019  ;;  %v771_v35 = vsel %vm755_vm15, %v747_v19, %v763_v22  ;;  %v819_v22 = vunpack.c.0.s8 %v3102_v14 }
 0x1a3   : > { %v1054_v27 = vadd.f32 %v3248_v20, %v1020_v29  ;;  %v3257_v40 = vsel %vm3250_vm0, %v771_v35, -1e+30 }
 0x1a4   : > { %vm3331_vm5 = vcmp.ne.s32.totalorder %v819_v22, 0 }
 0x1a5   : > { %vm1062_vm1 = vcmp.gt.f32.partialorder %v1054_v27, 0.0  ;;  %v1070_v43 = vmul.f32 0.2, %v1054_v27 }
 0x1a6   : > { %v1024_v44 = vpop.permute.xlu1 %1023 }
 0x1a7   : > { %v1055_v30 = vadd.f32 %v3248_v20, %v1024_v44  ;;  %v1078_v45 = vsel %vm1062_vm1, %v1054_v27, %v1070_v43 }
 0x1a8   : > { %v3262_v46 = vsel %vm3217_vm11, %v1078_v45, -1e+30 }
 0x1a9   : > { %1094 = vmax.xlane.f32.xlu1 %v3262_v46  ;;  %vm1063_vm2 = vcmp.gt.f32.partialorder %v1055_v30, 0.0  ;;  %v1071_v47 = vmul.f32 0.2, %v1055_v30 }
 0x1aa   : > { %v1028_v48 = vpop.permute.xlu1 %1027 }
 0x1ab   : > { %v1079_v49 = vsel %vm1063_vm2, %v1055_v30, %v1071_v47  ;;  %v1056_v19 = vadd.f32 %v3248_v20, %v1028_v48  ;;  %v820_v48 = vunpack.c.0.s8 %v3105_v15 }
 0x1ac   : > { %v3267_v50 = vsel %vm3229_vm14, %v1079_v49, -1e+30 }
 0x1ad   : > { %1096 = vmax.xlane.f32.xlu1 %v3267_v50  ;;  %vm1064_vm6 = vcmp.gt.f32.partialorder %v1056_v19, 0.0  ;;  %vm3354_vm8 = vcmp.ne.s32.totalorder %v820_v48, 0 }
 0x1ae   : > { %v1032_v52 = vpop.permute.xlu1 %1031 }
 0x1af   : > { %v1057_v35 = vadd.f32 %v3248_v20, %v1032_v52 }
 0x1b1   : > { %v1073_v45 = vmul.f32 0.2, %v1057_v35  ;;  %vm1065_vm7 = vcmp.gt.f32.partialorder %v1057_v35, 0.0 }
 0x1b2   : > { %v3272_v55 = vpop.permute.xlu1 %1035  ;;  %1194 = vrot.lane.b32.xlu0 %v3118_v23, %s2862_s23 }
 0x1b6   : > { %v3284_v60 = vpop.permute.xlu1 %1039  ;;  %1190 = vrot.lane.b32.xlu0 %v3128_v26, %s2862_s23 }
 0x1ba   : > { %v1044_v61 = vpop.permute.xlu1 %1043  ;;  %1188 = vrot.lane.b32.xlu0 %v3134_v28, %s2862_s23 }
 0x1bb   : > { %v1060_v63 = vadd.f32 %v3248_v20, %v1044_v61  ;;  %v1081_v61 = vsel %vm1065_vm7, %v1057_v35, %v1073_v45 }
 0x1bc   : > { %v3360_v15 = vsel %vm3354_vm8, %v1081_v61, -1e+30  ;;  %v782_v61 = vunpack.c.1.s8 %v3097_v11 }
 0x1bd   : > { %vm1068_vm3 = vcmp.gt.f32.partialorder %v1060_v63, 0.0  ;;  %v1076_v1 = vmul.f32 0.2, %v1060_v63 }
 0x1be   : > { %1192 = vrot.lane.b32.xlu1 %v3125_v25, %s2862_s23  ;;  %v3295_v2 = vpop.permute.xlu1 %1047  ;;  %1184 = vrot.lane.b32.xlu0 %v3149_v33, %s2862_s23 }
 0x1bf   : > { %v1084_v3 = vsel %vm1068_vm3, %v1060_v63, %v1076_v1  ;;  %v744_v63 = vadd.f32 %v3211_v51, %v3221_v0 }
 0x1c0   : > { %v3301_v5 = vsel %vm3250_vm0, %v1084_v3, -1e+30 }
 0x1c1   : > { %vm752_vm10 = vcmp.gt.f32.partialorder %v744_v63, 0.0 }
 0x1c2   : > { %1186 = vrot.lane.b32.xlu1 %v3141_v31, %s2862_s23  ;;  %1180 = vrot.lane.b32.xlu0 %v3159_v36, %s2862_s23  ;;  %v743_v36 = vadd.f32 %v3211_v51, %v3213_v54  ;;  %v1072_v54 = vmul.f32 0.2, %v1056_v19 }
 0x1c3   : > { %v3307_v9 = vpop.permute.xlu1 %1340 }
 0x1c4   : > { %vm751_vm4 = vcmp.gt.f32.partialorder %v743_v36, 0.0  ;;  %v1080_v30 = vsel %vm1064_vm6, %v1056_v19, %v1072_v54  ;;  %v760_v19 = vmul.f32 0.2, %v744_v63 }
 0x1c5   : > { %v3347_v49 = vsel %vm3331_vm5, %v1080_v30, -1e+30 }
 0x1c6   : > { %1182 = vrot.lane.b32.xlu1 %v3153_v34, %s2862_s23  ;;  %v759_v34 = vmul.f32 0.2, %v743_v36  ;;  %v768_v22 = vsel %vm752_vm10, %v744_v63, %v760_v19  ;;  %v795_v63 = vpack.c.b16 %v782_v61, %v782_v61  ;;  %v746_v19 = vadd.f32 %v3211_v51, %v3233_v7 }
 0x1c7   : > { %v3372_v54 = vsel %vm3354_vm8, %v768_v22, -1e+30  ;;  %v1058_v61 = vadd.f32 %v3248_v20, %v3272_v55 }
 0x1c8   : > { %v3311_v10 = vpop.permute.xlu1 %1637  ;;  %vm754_vm1 = vcmp.gt.f32.partialorder %v746_v19, 0.0 }
 0x1ca   : > { %1178 = vrot.lane.b32.xlu1 %v3167_v38, %s2862_s23  ;;  %v781_v38 = vunpack.c.0.s8 %v3097_v11 }
 0x1cc   : > { %v3315_v13 = vpop.permute.xlu1 %1641  ;;  %v793_v14 = vpack.c.b16 %v781_v38, %v781_v38 }
 0x1ce   : > { %1176 = vrot.lane.b32.xlu1 %v3174_v39, %s2862_s23  ;;  %v767_v39 = vsel %vm751_vm4, %v743_v36, %v759_v34  ;;  %v794_v52 = vpack.c.b8 %v793_v14, %v793_v14  ;;  %v745_v36 = vadd.f32 %v3211_v51, %v3235_v8  ;;  %vm1066_vm4 = vcmp.gt.f32.partialorder %v1058_v61, 0.0 }
 0x1cf   : > { %v3339_v44 = vsel %vm3331_vm5, %v767_v39, -1e+30 }
 0x1d0   : > { %vm805_vm9 = vnez %v794_v52  ;;  %v761_v38 = vmul.f32 0.2, %v745_v36  ;;  %vm753_vm12 = vcmp.gt.f32.partialorder %v745_v36, 0.0 }
 0x1d1   : > { %v3319_v16 = vpop.permute.xlu1 %1344  ;;  %v813_v0 = vsel %vm805_vm9, 16843009, %v2858_v58 }
 0x1d2   : > { %v821_v35 = vunpack.c.0.s8 %v813_v0  ;;  %v769_v14 = vsel %vm753_vm12, %v745_v36, %v761_v38  ;;  %v796_v36 = vpack.c.b8 %v795_v63, %v795_v63  ;;  %v3395_v0 = vpop.permute.xlu0 %1336  ;;  %v1059_v38 = vadd.f32 %v3248_v20, %v3284_v60 }
 0x1d4   : > { %vm3375_vm13 = vcmp.ne.s32.totalorder %v821_v35, 0  ;;  %vm806_vm15 = vnez %v796_v36  ;;  %vm1067_vm3 = vcmp.gt.f32.partialorder %v1059_v38, 0.0 }
 0x1d5   : > { %v3323_v18 = vpop.permute.xlu1 %1348  ;;  %v3383_v45 = vsel %vm3375_vm13, %v769_v14, -1e+30  ;;  %v814_v22 = vsel %vm806_vm15, 16843009, %v2858_v58 }
 0x1d6   : > { %v822_v35 = vunpack.c.0.s8 %v814_v22  ;;  %v3400_v11 = vpop.permute.xlu0 %1360  ;;  %v1074_v22 = vmul.f32 0.2, %v1058_v61 }
 0x1d8   : > { %vm3402_vm2 = vcmp.ne.s32.totalorder %v822_v35, 0 }
 0x1da   : > { %v3327_v29 = vpop.permute.xlu1 %1645  ;;  %v3406_v7 = vpop.permute.xlu0 %1661 }
 0x1db   : > { %3992 = vst [vmem:[#allocation15_spill] sm:$0xff] %v3406_v7 }
 0x1de   : > { %v3335_v43 = vpop.permute.xlu1 %1649 }
 0x1e1   : > { %845 = vmax.xlane.f32.xlu0 %v3339_v44 }
 0x1e3   : > { %v3342_v47 = vpop.permute.xlu1 %1352 }
 0x1e5   : > { %1098 = vmax.xlane.f32.xlu0 %v3347_v49 }
 0x1e7   : > { %v3352_v1 = vpop.permute.xlu1 %1356 }
 0x1e9   : > { %1100 = vmax.xlane.f32.xlu0 %v3360_v15 }
 0x1ec   : > { %v3366_v34 = vpop.permute.xlu1 %1653 }
 0x1f0   : > { %v3368_v39 = vpop.permute.xlu1 %1657 }
 0x1f2   : > { %847 = vmax.xlane.f32.xlu1 %v3372_v54 }
 0x1f5   : > { %v3379_v30 = vpop.permute.xlu1 %1364 }
 0x1f6   : > { %849 = vmax.xlane.f32.xlu1 %v3383_v45 }
 0x1fa   : > { %v3386_v48 = vpop.permute.xlu1 %1665 }
 0x1fe   : > { %v1197_v52 = vpop.permute.xlu1 %1196 }
 0x1ff   : > { %2397 = vmatprep.subr.mxu1 %v1197_v52  ;;  %1174 = vrot.lane.b32.xlu0 %v3195_v41, %s2862_s23  ;;  %v762_v41 = vmul.f32 0.2, %v746_v19 }
 0x200   : > { %2398 = vmatpush3.msra.mxu1 %v1197_v52  ;;  %v1075_v52 = vmul.f32 0.2, %v1059_v38 }
 0x201   : > { %v770_v14 = vsel %vm754_vm1, %v746_v19, %v762_v41 }
 0x202   : > { %v3410_v58 = vsel %vm3402_vm2, %v770_v14, -1e+30  ;;  %v1083_v60 = vsel %vm1067_vm3, %v1059_v38, %v1075_v52  ;;  %v1082_v38 = vsel %vm1066_vm4, %v1058_v61, %v1074_v22 }
 0x203   : > { %v3417_v36 = vsel %vm3402_vm2, %v1083_v60, -1e+30  ;;  %v3424_v55 = vsel %vm3375_vm13, %v1082_v38, -1e+30 }
 0x207   : > { %1172 = vrot.lane.b32.xlu1 %v3199_v42, %s2862_s23 }
 0x21e   : > { %851 = vmax.xlane.f32.xlu0 %v3410_v58 }
 0x221   : > { %v842_v63 = vpop.xlane.xlu0 %841 }
 0x222   : > { %v857_v19 = vsub.f32 %v3226_v4, %v842_v63  ;;  %1104 = vmax.xlane.f32.xlu0 %v3417_v36 }
 0x224   : > { %v865_v41 = vmul.f32 1.442695, %v857_v19 }
 0x225   : > { %v844_v35 = vpop.xlane.xlu0 %843 }
 0x226   : > { %2628 = vpow2.f32 %v865_v41  ;;  %v858_v14 = vsub.f32 %v3240_v12, %v844_v35 }
 0x228   : > { %v867_v52 = vmul.f32 1.442695, %v858_v14 }
 0x229   : > { %v1195_v7 = vpop.permute.xlu0 %1194 }
 0x22a   : > { %2630 = vpow2.f32 %v867_v52  ;;  %2399 = vmatprep.subr.mxu1 %v1195_v7 }
 0x22b   : > { %1102 = vmax.xlane.f32.xlu1 %v3424_v55  ;;  %2400 = vmatpush3.msra.mxu1 %v1195_v7 }
 0x22d   : > { %v1191_v12 = vpop.permute.xlu0 %1190 }
 0x22f   : > { %853 = vmax.xlane.f32.xlu1 %v3257_v40 }
 0x231   : > { %v1189_v7 = vpop.permute.xlu0 %1188 }
 0x232   : > { %v1095_v4 = vpop.xlane.xlu1 %1094 }
 0x233   : > { %v3428_v60 = vpop.eup %2628  ;;  %v1110_v63 = vsub.f32 %v3262_v46, %v1095_v4 }
 0x234   : > { %2385 = vmatprep.mubr.f32.mxu0 %v3428_v60 }
 0x235   : > { %v1118_v61 = vmul.f32 1.442695, %v1110_v63  ;;  %v1185_v35 = vpop.permute.xlu0 %1184 }
 0x236   : > { %v3432_v19 = vpop.xlane.xlu1 %1096 }
 0x237   : > { %v3434_v22 = vpop.eup %2630  ;;  %2632 = vpow2.f32 %v1118_v61  ;;  %v1061_v61 = vadd.f32 %v3248_v20, %v3295_v2 }
 0x238   : > { %1170 = vrot.lane.b32.xlu0 %v3270_v53, %s2862_s23  ;;  %2386 = vmatmul.mubr.f32.vlgmr.msra.gmra.mxu0 %v3434_v22 }
 0x239   : > { %v1181_v52 = vpop.permute.xlu0 %1180  ;;  %vm1069_vm9 = vcmp.gt.f32.partialorder %v1061_v61, 0.0 }
 0x23a   : > { %v1193_v41 = vpop.permute.xlu1 %1192 }
 0x23b   : > { %2401 = vmatprep.subr.mxu1 %v1193_v41 }
 0x23c   : > { %2402 = vmatpush3.msra.mxu1 %v1193_v41  ;;  %v824_v41 = vunpack.c.0.s8 %v3113_v21 }
 0x23d   : > { %2403 = vmatprep.subr.mxu1 %v1191_v12 }
 0x23e   : > { %v1187_v46 = vpop.permute.xlu1 %1186  ;;  %2404 = vmatpush3.msra.mxu1 %v1191_v12  ;;  %v748_v12 = vadd.f32 %v3211_v51, %v3244_v17  ;;  %vm3449_vm7 = vcmp.ne.s32.totalorder %v824_v41, 0 }
 0x23f   : > { %2405 = vmatprep.subr.mxu1 %v1189_v7 }
 0x240   : > { %1168 = vrot.lane.b32.xlu1 %v3278_v56, %s2862_s23  ;;  %2406 = vmatpush3.msra.mxu1 %v1189_v7  ;;  %v764_v7 = vmul.f32 0.2, %v748_v12  ;;  %vm756_vm6 = vcmp.gt.f32.partialorder %v748_v12, 0.0 }
 0x241   : > { %2407 = vmatprep.subr.mxu1 %v1187_v46 }
 0x242   : > { %v1183_v14 = vpop.permute.xlu1 %1182  ;;  %2408 = vmatpush3.msra.mxu1 %v1187_v46  ;;  %v772_v46 = vsel %vm756_vm6, %v748_v12, %v764_v7 }
 0x243   : > { %2409 = vmatprep.subr.mxu1 %v1185_v35 }
 0x244   : > { %v3441_v38 = vpop.eup %2632  ;;  %2410 = vmatpush3.msra.mxu1 %v1185_v35 }
 0x245   : > { %2411 = vmatprep.subr.mxu1 %v1183_v14  ;;  %2429 = vmatprep.mubr.f32.mxu1 %v3441_v38 }
 0x246   : > { %v1179_v4 = vpop.permute.xlu1 %1178  ;;  %2412 = vmatpush3.msra.mxu1 %v1183_v14  ;;  %v1077_v14 = vmul.f32 0.2, %v1061_v61 }
 0x247   : > { %2413 = vmatprep.subr.mxu1 %v1181_v52 }
 0x248   : > { %2414 = vmatpush3.msra.mxu1 %v1181_v52  ;;  %v3455_v52 = vsel %vm3449_vm7, %v772_v46, -1e+30  ;;  %v1085_v51 = vsel %vm1069_vm9, %v1061_v61, %v1077_v14 }
 0x249   : > { %2415 = vmatprep.subr.mxu1 %v1179_v4  ;;  %v3460_v17 = vsel %vm3449_vm7, %v1085_v51, -1e+30 }
 0x24a   : > { %v1177_v63 = vpop.permute.xlu1 %1176  ;;  %2416 = vmatpush3.msra.mxu1 %v1179_v4 }
 0x24b   : > { %2417 = vmatprep.subr.mxu1 %v1177_v63 }
 0x24c   : > { %2418 = vmatpush3.msra.mxu1 %v1177_v63 }
 0x257   : > { %855 = vmax.xlane.f32.xlu0 %v3455_v52 }
 0x25b   : > { %1108 = vmax.xlane.f32.xlu0 %v3460_v17 }
 0x264   : > { %1106 = vmax.xlane.f32.xlu1 %v3301_v5 }
 0x26a   : > { %v846_v21 = vpop.xlane.xlu0 %845 }
 0x26b   : > { %v859_v20 = vsub.f32 %v3339_v44, %v846_v21 }
 0x26d   : > { %v869_v2 = vmul.f32 1.442695, %v859_v20  ;;  %v1672_v20 = vadd.f32 %v3162_v37, %v3311_v10 }
 0x26e   : > { %v3465_v4 = vpop.xlane.xlu0 %1098 }
 0x26f   : > { %2634 = vpow2.f32 %v869_v2  ;;  %vm1680_vm12 = vcmp.gt.f32.partialorder %v1672_v20, 0.0 }
 0x271   : > { %1166 = vrot.lane.b32.xlu0 %v3282_v57, %s2862_s23 }
 0x272   : > { %v3469_v63 = vpop.xlane.xlu0 %1100 }
 0x275   : > { %1798 = vrot.lane.b32.xlu0 %v3067_v59, %s2863_s9  ;;  %1497 = vrot.lane.b32.xlu1 %v3067_v59, %s2864_s12  ;;  %v1372_v59 = vadd.f32 %v3145_v32, %v3307_v9 }
 0x276   : > { %v1175_v12 = vpop.permute.xlu0 %1174 }
 0x277   : > { %2419 = vmatprep.subr.mxu1 %v1175_v12  ;;  %v1388_v2 = vmul.f32 0.2, %v1372_v59  ;;  %vm1380_vm10 = vcmp.gt.f32.partialorder %v1372_v59, 0.0 }
 0x278   : > { %2420 = vmatpush3.msra.mxu1 %v1175_v12  ;;  %v1371_v12 = vadd.f32 %v3145_v32, %v3395_v0 }
 0x27a   : > { %v1387_v9 = vmul.f32 0.2, %v1371_v12  ;;  %vm1379_vm15 = vcmp.gt.f32.partialorder %v1371_v12, 0.0 }
 0x27b   : > { %v848_v44 = vpop.xlane.xlu1 %847 }
 0x27c   : > { %v3475_v61 = vpop.eup %2634  ;;  %v860_v7 = vsub.f32 %v3372_v54, %v848_v44  ;;  %v1396_v44 = vsel %vm1380_vm10, %v1372_v59, %v1388_v2 }
 0x27d   : > { %2388 = vmatprep.mubr.f32.mxu0 %v3475_v61  ;;  %v3496_v10 = vsel %vm3229_vm14, %v1396_v44, -1e+30 }
 0x27e   : > { %v871_v41 = vmul.f32 1.442695, %v860_v7  ;;  %v1688_v7 = vmul.f32 0.2, %v1672_v20 }
 0x27f   : > { %v850_v46 = vpop.xlane.xlu1 %849 }
 0x280   : > { %2636 = vpow2.f32 %v871_v41  ;;  %v861_v14 = vsub.f32 %v3383_v45, %v850_v46  ;;  %v1673_v45 = vadd.f32 %v3162_v37, %v3315_v13  ;;  %v1696_v0 = vsel %vm1680_vm12, %v1672_v20, %v1688_v7 }
 0x281   : > { %v3501_v13 = vsel %vm3217_vm11, %v1696_v0, -1e+30 }
 0x282   : > { %v873_v51 = vmul.f32 1.442695, %v861_v14  ;;  %v1689_v46 = vmul.f32 0.2, %v1673_v45  ;;  %v1395_v14 = vsel %vm1379_vm15, %v1371_v12, %v1387_v9  ;;  %vm1681_vm1 = vcmp.gt.f32.partialorder %v1673_v45, 0.0 }
 0x283   : > { %v1173_v21 = vpop.permute.xlu1 %1172  ;;  %vm2051_vm15 = vcmask 785408  }
 0x284   : > { %2638 = vpow2.f32 %v873_v51  ;;  %2421 = vmatprep.subr.mxu1 %v1173_v21  ;;  %v3506_v51 = vsel %vm3217_vm11, %v1395_v14, -1e+30 }
 0x285   : > { %2422 = vmatpush3.msra.mxu1 %v1173_v21  ;;  %v1697_v21 = vsel %vm1681_vm1, %v1673_v45, %v1689_v46  ;;  %v1373_v46 = vadd.f32 %v3145_v32, %v3319_v16 }
 0x286   : > { %v3511_v59 = vsel %vm3229_vm14, %v1697_v21, -1e+30 }
 0x287   : > { %vm1381_vm11 = vcmp.gt.f32.partialorder %v1373_v46, 0.0 }
 0x28d   : > { %v3484_v54 = vpop.eup %2636 }
 0x28e   : > { %2389 = vmatmul.mubr.f32.gmra.mxu0 %v3484_v54 }
 0x291   : > { %v3491_v41 = vpop.eup %2638 }
 0x292   : > { %2391 = vmatprep.mubr.f32.mxu0 %v3491_v41 }
 0x294   : > { %1413 = vmax.xlane.f32.xlu0 %v3496_v10 }
 0x298   : > { %1712 = vmax.xlane.f32.xlu0 %v3501_v13 }
 0x299   : > { %1411 = vmax.xlane.f32.xlu1 %v3506_v51 }
 0x29c   : > { %1714 = vmax.xlane.f32.xlu0 %v3511_v59 }
 0x2a7   : > { %v852_v20 = vpop.xlane.xlu0 %851 }
 0x2a8   : > { %v862_v2 = vsub.f32 %v3410_v58, %v852_v20 }
 0x2aa   : > { %v875_v12 = vmul.f32 1.442695, %v862_v2  ;;  %1495 = vrot.lane.b32.xlu1 %v3118_v23, %s2864_s12  ;;  %v1675_v2 = vadd.f32 %v3162_v37, %v3335_v43 }
 0x2ab   : > { %v1105_v44 = vpop.xlane.xlu0 %1104 }
 0x2ac   : > { %2640 = vpow2.f32 %v875_v12  ;;  %v1691_v43 = vmul.f32 0.2, %v1675_v2  ;;  %vm1683_vm4 = vcmp.gt.f32.partialorder %v1675_v2, 0.0  ;;  %v1115_v27 = vsub.f32 %v3417_v36, %v1105_v44 }
 0x2ae   : > { %1493 = vrot.lane.b32.xlu1 %v3125_v25, %s2864_s12 }
 0x2af   : > { %v1171_v62 = vpop.permute.xlu0 %1170 }
 0x2b0   : > { %2423 = vmatprep.subr.mxu1 %v1171_v62 }
 0x2b1   : > { %2424 = vmatpush3.msra.mxu1 %v1171_v62 }
 0x2b2   : > { %1796 = vrot.lane.b32.xlu0 %v3118_v23, %s2863_s9  ;;  %v1374_v23 = vadd.f32 %v3145_v32, %v3323_v18 }
 0x2b4   : > { %v1103_v6 = vpop.xlane.xlu1 %1102  ;;  %v1390_v21 = vmul.f32 0.2, %v1374_v23  ;;  %vm1382_vm14 = vcmp.gt.f32.partialorder %v1374_v23, 0.0 }
 0x2b6   : > { %1794 = vrot.lane.b32.xlu0 %v3125_v25, %s2863_s9  ;;  %v1389_v25 = vmul.f32 0.2, %v1373_v46  ;;  %v1398_v18 = vsel %vm1382_vm14, %v1374_v23, %v1390_v21  ;;  %v1699_v23 = vsel %vm1683_vm4, %v1675_v2, %v1691_v43 }
 0x2b7   : > { %v3545_v62 = vsel %vm3354_vm8, %v1398_v18, -1e+30 }
 0x2b8   : > { %v854_v58 = vpop.xlane.xlu1 %853  ;;  %v1397_v20 = vsel %vm1381_vm11, %v1373_v46, %v1389_v25  ;;  %v1113_v46 = vsub.f32 %v3360_v15, %v3469_v63  ;;  %v3562_v25 = vsel %vm3354_vm8, %v1699_v23, -1e+30  ;;  %v1128_v63 = vmul.f32 1.442695, %v1115_v27 }
 0x2b9   : > { %v3523_v45 = vpop.eup %2640  ;;  %v863_v7 = vsub.f32 %v3257_v40, %v854_v58  ;;  %v1674_v40 = vadd.f32 %v3162_v37, %v3327_v29  ;;  %v3540_v16 = vsel %vm3331_vm5, %v1397_v20, -1e+30  ;;  %v1111_v29 = vsub.f32 %v3267_v50, %v3432_v19 }
 0x2ba   : > { %2392 = vmatmul.mubr.f32.gmra.mxu0 %v3523_v45  ;;  %v1114_v19 = vsub.f32 %v3424_v55, %v1103_v6 }
 0x2bb   : > { %v877_v9 = vmul.f32 1.442695, %v863_v7  ;;  %v1690_v12 = vmul.f32 0.2, %v1674_v40  ;;  %vm1682_vm3 = vcmp.gt.f32.partialorder %v1674_v40, 0.0  ;;  %v1112_v7 = vsub.f32 %v3347_v49, %v3465_v4 }
 0x2bc   : > { %v1169_v0 = vpop.permute.xlu1 %1168  ;;  %v1124_v49 = vmul.f32 1.442695, %v1113_v46  ;;  %v1126_v4 = vmul.f32 1.442695, %v1114_v19 }
 0x2bd   : > { %2642 = vpow2.f32 %v877_v9  ;;  %2425 = vmatprep.subr.mxu1 %v1169_v0  ;;  %v1698_v58 = vsel %vm1682_vm3, %v1674_v40, %v1690_v12  ;;  %v1122_v50 = vmul.f32 1.442695, %v1112_v7  ;;  %v1375_v7 = vadd.f32 %v3145_v32, %v3342_v47 }
 0x2be   : > { %2426 = vmatpush3.msra.mxu1 %v1169_v0  ;;  %v3554_v9 = vsel %vm3331_vm5, %v1698_v58, -1e+30  ;;  %v1120_v0 = vmul.f32 1.442695, %v1111_v29  ;;  %v1677_v47 = vadd.f32 %v3162_v37, %v3368_v39 }
 0x2bf   : > { %v1391_v46 = vmul.f32 0.2, %v1375_v7  ;;  %vm1383_vm5 = vcmp.gt.f32.partialorder %v1375_v7, 0.0 }
 0x2c0   : > { %2644 = vpow2.f32 %v1120_v0  ;;  %v1693_v27 = vmul.f32 0.2, %v1677_v47  ;;  %vm1685_vm6 = vcmp.gt.f32.partialorder %v1677_v47, 0.0 }
 0x2c1   : > { %2646 = vpow2.f32 %v1122_v50  ;;  %v1399_v23 = vsel %vm1383_vm5, %v1375_v7, %v1391_v46  ;;  %v1376_v50 = vadd.f32 %v3145_v32, %v3352_v1  ;;  %v1377_v46 = vadd.f32 %v3145_v32, %v3400_v11 }
 0x2c2   : > { %2648 = vpow2.f32 %v1124_v49  ;;  %v1701_v1 = vsel %vm1685_vm6, %v1677_v47, %v1693_v27 }
 0x2c3   : > { %2650 = vpow2.f32 %v1126_v4  ;;  %v1392_v19 = vmul.f32 0.2, %v1376_v50  ;;  %vm1384_vm8 = vcmp.gt.f32.partialorder %v1376_v50, 0.0  ;;  %vm1385_vm9 = vcmp.gt.f32.partialorder %v1377_v46, 0.0 }
 0x2c5   : > { %v1400_v49 = vsel %vm1384_vm8, %v1376_v50, %v1392_v19 }
 0x2c6   : > { %v3614_v4 = vsel %vm3402_vm2, %v1400_v49, -1e+30 }
 0x2ca   : > { %v3531_v14 = vpop.eup %2642 }
 0x2cb   : > { %2394 = vmatprep.mubr.f32.mxu0 %v3531_v14 }
 0x2cd   : > { %v3571_v36 = vpop.eup %2644 }
 0x2ce   : > { %v3573_v44 = vpop.eup %2646 }
 0x2cf   : > { %v3578_v2 = vpop.eup %2648 }
 0x2d0   : > { %v3581_v18 = vpop.eup %2650 }
 0x2d2   : > { %1415 = vmax.xlane.f32.xlu1 %v3540_v16 }
 0x2d5   : > { %1417 = vmax.xlane.f32.xlu0 %v3545_v62 }
 0x2d9   : > { %1716 = vmax.xlane.f32.xlu0 %v3554_v9 }
 0x2dd   : > { %1718 = vmax.xlane.f32.xlu0 %v3562_v25 }
 0x2e0   : > { %v856_v40 = vpop.xlane.xlu0 %855 }
 0x2e1   : > { %v864_v15 = vsub.f32 %v3455_v52, %v856_v40  ;;  %v3619_v40 = vsel %vm3402_vm2, %v1701_v1, -1e+30  ;;  %v2756_v1 = vld [vmem:[#allocation2 + $0x40] sm:$0xff] }
 0x2e3   : > { %v879_v21 = vmul.f32 1.442695, %v864_v15  ;;  %1491 = vrot.lane.b32.xlu1 %v3128_v26, %s2864_s12 }
 0x2e4   : > { %v1109_v3 = vpop.xlane.xlu0 %1108 }
 0x2e5   : > { %2652 = vpow2.f32 %v879_v21  ;;  %v1117_v52 = vsub.f32 %v3460_v17, %v1109_v3 }
 0x2e6   : > { %2654 = vpow2.f32 %v1128_v63 }
 0x2e7   : > { %1792 = vrot.lane.b32.xlu1 %v3128_v26, %s2863_s9  ;;  %v1132_v12 = vmul.f32 1.442695, %v1117_v52 }
 0x2e8   : > { %v1167_v55 = vpop.permute.xlu0 %1166 }
 0x2e9   : > { %2427 = vmatprep.subr.mxu1 %v1167_v55 }
 0x2ea   : > { %2428 = vmatpush3.msra.mxu1 %v1167_v55 }
 0x2eb   : > { %2430 = vmatmul.mubr.f32.vlgmr.msra.gmra.mxu1 %v3571_v36 }
 0x2ec   : > { %2432 = vmatprep.mubr.f32.mxu1 %v3573_v44  ;;  %v1799_v6 = vpop.permute.xlu0 %1798 }
 0x2ed   : > { %v1107_v20 = vpop.xlane.xlu1 %1106  ;;  %2485 = vmatprep.subr.mxu1 %v1799_v6 }
 0x2ee   : > { %v1116_v26 = vsub.f32 %v3301_v5, %v1107_v20  ;;  %2486 = vmatpush3.msra.mxu1 %v1799_v6 }
 0x2ef   : > { %2433 = vmatmul.mubr.f32.gmra.mxu1 %v3578_v2 }
 0x2f0   : > { %v1130_v29 = vmul.f32 1.442695, %v1116_v26  ;;  %2435 = vmatprep.mubr.f32.mxu1 %v3581_v18 }
 0x2f1   : > { %v1498_v17 = vpop.permute.xlu1 %1497 }
 0x2f2   : > { %v3585_v58 = vpop.eup %2652  ;;  %2656 = vpow2.f32 %v1130_v29  ;;  %2441 = vmatprep.subr.mxu0 %v1498_v17  ;;  %v1676_v29 = vadd.f32 %v3162_v37, %v3366_v34  ;;  %v1393_v34 = vmul.f32 0.2, %v1377_v46 }
 0x2f3   : > { %v3587_v43 = vpop.eup %2654  ;;  %2658 = vpow2.f32 %v1132_v12  ;;  %1489 = vrot.lane.b32.xlu0 %v3134_v28, %s2864_s12  ;;  %2395 = vmatmul.mubr.f32.gmra.mxu0 %v3585_v58 }
 0x2f4   : > { %2436 = vmatmul.mubr.f32.gmra.mxu1 %v3587_v43  ;;  %2442 = vmatpush3.msra.mxu0 %v1498_v17  ;;  %v1692_v17 = vmul.f32 0.2, %v1676_v29  ;;  %vm1684_vm2 = vcmp.gt.f32.partialorder %v1676_v29, 0.0 }
 0x2f6   : > { %v1700_v7 = vsel %vm1684_vm2, %v1676_v29, %v1692_v17  ;;  %v2757_v17 = vld [vmem:[#allocation2 + $0x48] sm:$0xff] }
 0x2f7   : > { %1790 = vrot.lane.b32.xlu0 %v3134_v28, %s2863_s9  ;;  %v3607_v28 = vsel %vm3375_vm13, %v1399_v23, -1e+30  ;;  %v1401_v23 = vsel %vm1385_vm9, %v1377_v46, %v1393_v34  ;;  %v2759_v46 = vld [vmem:[#allocation2 + $0x68] sm:$0xff]  ;;  %v2760_v34 = vld [vmem:[#allocation2 + $0x50] sm:$0xff] }
 0x2f8   : > { %v3653_v50 = vsel %vm3250_vm0, %v1401_v23, -1e+30  ;;  %v2761_v23 = vld [vmem:[#allocation2 + $0x18] sm:$0xff] }
 0x2ff   : > { %v3595_v5 = vpop.eup %2656 }
 0x300   : > { %v3599_v0 = vpop.eup %2658  ;;  %2438 = vmatprep.mubr.f32.mxu1 %v3595_v5 }
 0x301   : > { %2439 = vmatmul.mubr.f32.gmra.mxu1 %v3599_v0 }
 0x30b   : > { %1419 = vmax.xlane.f32.xlu1 %v3607_v28 }
 0x316   : > { %1421 = vmax.xlane.f32.xlu0 %v3614_v4 }
 0x31a   : > { %1722 = vmax.xlane.f32.xlu0 %v3619_v40 }
 0x31c   : > { %1487 = vrot.lane.b32.xlu1 %v3141_v31, %s2864_s12 }
 0x31d   : > { %v3624_v39 = vpop.xlane.xlu0 %1413 }
 0x321   : > { %v1713_v15 = vpop.xlane.xlu0 %1712 }
 0x322   : > { %v1728_v63 = vsub.f32 %v3501_v13, %v1713_v15  ;;  %v1412_v21 = vpop.xlane.xlu1 %1411 }
 0x323   : > { %v1427_v3 = vsub.f32 %v3506_v51, %v1412_v21  ;;  %v1679_v21 = vadd.f32 %v3162_v37, %v3386_v48  ;;  %v3995_v48 = vld [vmem:[#allocation15_spill] sm:$0xff] }
 0x324   : > { %v1736_v55 = vmul.f32 1.442695, %v1728_v63 }
 0x325   : > { %v1435_v52 = vmul.f32 1.442695, %v1427_v3  ;;  %v3628_v6 = vpop.xlane.xlu0 %1714  ;;  %vm1687_vm10 = vcmp.gt.f32.partialorder %v1679_v21, 0.0 }
 0x326   : > { %2660 = vpow2.f32 %v1736_v55  ;;  %v1496_v42 = vpop.permute.xlu1 %1495  ;;  %v1695_v55 = vmul.f32 0.2, %v1679_v21 }
 0x327   : > { %2662 = vpow2.f32 %v1435_v52  ;;  %2443 = vmatprep.subr.mxu0 %v1496_v42 }
 0x328   : > { %2444 = vmatpush3.msra.mxu0 %v1496_v42 }
 0x329   : > { %v1797_v20 = vpop.permute.xlu0 %1796 }
 0x32a   : > { %v1494_v26 = vpop.permute.xlu1 %1493  ;;  %2487 = vmatprep.subr.mxu1 %v1797_v20 }
 0x32b   : > { %2445 = vmatprep.subr.mxu0 %v1494_v26  ;;  %2488 = vmatpush3.msra.mxu1 %v1797_v20  ;;  %v1678_v20 = vadd.f32 %v3162_v37, %v3995_v48 }
 0x32c   : > { %2446 = vmatpush3.msra.mxu0 %v1494_v26 }
 0x32d   : > { %v1795_v12 = vpop.permute.xlu0 %1794  ;;  %v1694_v26 = vmul.f32 0.2, %v1678_v20  ;;  %vm1686_vm12 = vcmp.gt.f32.partialorder %v1678_v20, 0.0 }
 0x32e   : > { %2489 = vmatprep.subr.mxu1 %v1795_v12 }
 0x32f   : > { %2490 = vmatpush3.msra.mxu1 %v1795_v12  ;;  %v1702_v12 = vsel %vm1686_vm12, %v1678_v20, %v1694_v26 }
 0x330   : > { %1788 = vrot.lane.b32.xlu0 %v3141_v31, %s2863_s9  ;;  %v3644_v31 = vsel %vm3375_vm13, %v1700_v7, -1e+30  ;;  %v3683_v29 = vsel %vm3250_vm0, %v1702_v12, -1e+30  ;;  %v2758_v7 = vld [vmem:[#allocation2 + $0x8] sm:$0xff]  ;;  %vm2042_vm0 = vcmask 523264  }
 0x333   : > { %v3632_v13 = vpop.eup %2660 }
 0x334   : > { %v3634_v51 = vpop.eup %2662  ;;  %1485 = vrot.lane.b32.xlu0 %v3149_v33, %s2864_s12  ;;  %2517 = vmatprep.mubr.f32.mxu1 %v3632_v13 }
 0x335   : > { %2473 = vmatprep.mubr.f32.mxu0 %v3634_v51 }
 0x340   : > { %1720 = vmax.xlane.f32.xlu1 %v3644_v31 }
 0x351   : > { %1786 = vrot.lane.b32.xlu1 %v3149_v33, %s2863_s9  ;;  %v1378_v33 = vadd.f32 %v3145_v32, %v3379_v30  ;;  %v1703_v30 = vsel %vm1687_vm10, %v1679_v21, %v1695_v55  ;;  %v1729_v55 = vsub.f32 %v3511_v59, %v3628_v6 }
 0x352   : > { %v3676_v42 = vsel %vm3449_vm7, %v1703_v30, -1e+30 }
 0x353   : > { %1423 = vmax.xlane.f32.xlu0 %v3653_v50  ;;  %v1394_v63 = vmul.f32 0.2, %v1378_v33  ;;  %vm1386_vm13 = vcmp.gt.f32.partialorder %v1378_v33, 0.0  ;;  %v1738_v20 = vmul.f32 1.442695, %v1729_v55 }
 0x355   : > { %v1402_v52 = vsel %vm1386_vm13, %v1378_v33, %v1394_v63 }
 0x356   : > { %v3671_v32 = vsel %vm3449_vm7, %v1402_v52, -1e+30  ;;  %vm2033_vm7 = vcmask 261120  }
 0x35b   : > { %v3656_v8 = vpop.xlane.xlu1 %1415 }
 0x35e   : > { %v3658_v47 = vpop.xlane.xlu0 %1417 }
 0x35f   : > { %v1492_v19 = vpop.permute.xlu1 %1491 }
 0x360   : > { %2447 = vmatprep.subr.mxu0 %v1492_v19 }
 0x361   : > { %2448 = vmatpush3.msra.mxu0 %v1492_v19 }
 0x362   : > { %v3660_v11 = vpop.xlane.xlu0 %1716 }
 0x363   : > { %v1793_v49 = vpop.permute.xlu1 %1792 }
 0x364   : > { %2491 = vmatprep.subr.mxu1 %v1793_v49 }
 0x365   : > { %2492 = vmatpush3.msra.mxu1 %v1793_v49 }
 0x366   : > { %v3662_v27 = vpop.xlane.xlu0 %1718 }
 0x369   : > { %1483 = vrot.lane.b32.xlu0 %v2756_v1, %s2864_s12 }
 0x36a   : > { %v1490_v15 = vpop.permute.xlu0 %1489 }
 0x36b   : > { %2449 = vmatprep.subr.mxu0 %v1490_v15 }
 0x36c   : > { %2450 = vmatpush3.msra.mxu0 %v1490_v15  ;;  %v1428_v15 = vsub.f32 %v3496_v10, %v3624_v39 }
 0x36e   : > { %v1791_v3 = vpop.permute.xlu0 %1790  ;;  %v1437_v21 = vmul.f32 1.442695, %v1428_v15 }
 0x36f   : > { %2493 = vmatprep.subr.mxu1 %v1791_v3 }
 0x370   : > { %2494 = vmatpush3.msra.mxu1 %v1791_v3  ;;  %2664 = vpow2.f32 %v1437_v21 }
 0x375   : > { %1425 = vmax.xlane.f32.xlu1 %v3671_v32 }
 0x379   : > { %1726 = vmax.xlane.f32.xlu1 %v3676_v42 }
 0x388   : > { %1724 = vmax.xlane.f32.xlu0 %v3683_v29 }
 0x38a   : > { %1784 = vrot.lane.b32.xlu1 %v2756_v1, %s2863_s9 }
 0x38e   : > { %1481 = vrot.lane.b32.xlu1 %v2757_v17, %s2864_s12 }
 0x392   : > { %1782 = vrot.lane.b32.xlu1 %v2757_v17, %s2863_s9 }
 0x394   : > { %v1420_v35 = vpop.xlane.xlu1 %1419 }
 0x395   : > { %v1431_v39 = vsub.f32 %v3607_v28, %v1420_v35 }
 0x396   : > { %1780 = vrot.lane.b32.xlu1 %v2758_v7, %s2863_s9 }
 0x398   : > { %v1488_v37 = vpop.permute.xlu1 %1487 }
 0x399   : > { %2451 = vmatprep.subr.mxu0 %v1488_v37 }
 0x39a   : > { %1477 = vrot.lane.b32.xlu1 %v2759_v46, %s2864_s12  ;;  %2452 = vmatpush3.msra.mxu0 %v1488_v37 }
 0x39e   : > { %1778 = vrot.lane.b32.xlu1 %v2759_v46, %s2863_s9  ;;  %1479 = vrot.lane.b32.xlu0 %v2758_v7, %s2864_s12 }
 0x39f   : > { %v1422_v24 = vpop.xlane.xlu0 %1421 }
 0x3a0   : > { %v1432_v3 = vsub.f32 %v3614_v4, %v1422_v24 }
 0x3a2   : > { %1475 = vrot.lane.b32.xlu1 %v2760_v34, %s2864_s12  ;;  %1473 = vrot.lane.b32.xlu0 %v2761_v23, %s2864_s12  ;;  %v1445_v10 = vmul.f32 1.442695, %v1432_v3 }
 0x3a3   : > { %v3695_v19 = vpop.xlane.xlu0 %1722 }
 0x3a4   : > { %v1733_v17 = vsub.f32 %v3619_v40, %v3695_v19 }
 0x3a6   : > { %1776 = vrot.lane.b32.xlu1 %v2760_v34, %s2863_s9  ;;  %1471 = vrot.lane.b32.xlu0 %v3270_v53, %s2864_s12  ;;  %v1746_v59 = vmul.f32 1.442695, %v1733_v17 }
 0x3a7   : > { %v1789_v49 = vpop.permute.xlu0 %1788 }
 0x3a8   : > { %2495 = vmatprep.subr.mxu1 %v1789_v49 }
 0x3a9   : > { %2496 = vmatpush3.msra.mxu1 %v1789_v49 }
 0x3aa   : > { %1774 = vrot.lane.b32.xlu1 %v2761_v23, %s2863_s9  ;;  %1469 = vrot.lane.b32.xlu0 %v3278_v56, %s2864_s12 }
 0x3ab   : > { %v1486_v33 = vpop.permute.xlu0 %1485 }
 0x3ac   : > { %2453 = vmatprep.subr.mxu0 %v1486_v33 }
 0x3ad   : > { %2454 = vmatpush3.msra.mxu0 %v1486_v33 }
 0x3ae   : > { %1772 = vrot.lane.b32.xlu1 %v3270_v53, %s2863_s9  ;;  %1467 = vrot.lane.b32.xlu0 %v3282_v57, %s2864_s12  ;;  %v1430_v53 = vsub.f32 %v3545_v62, %v3658_v47  ;;  %v1443_v62 = vmul.f32 1.442695, %v1431_v39 }
 0x3b2   : > { %1770 = vrot.lane.b32.xlu1 %v3278_v56, %s2863_s9  ;;  %v1441_v56 = vmul.f32 1.442695, %v1430_v53 }
 0x3b4   : > { %2666 = vpow2.f32 %v1441_v56 }
 0x3b5   : > { %2668 = vpow2.f32 %v1445_v10 }
 0x3b6   : > { %1768 = vrot.lane.b32.xlu1 %v3282_v57, %s2863_s9  ;;  %v1429_v57 = vsub.f32 %v3540_v16, %v3656_v8  ;;  %v3727_v16 = vpop.eup %2664 }
 0x3c9   : > { %v1721_v1 = vpop.xlane.xlu1 %1720 }
 0x3ca   : > { %v1732_v28 = vsub.f32 %v3644_v31, %v1721_v1 }
 0x3cd   : > { %v1787_v63 = vpop.permute.xlu1 %1786  ;;  %1134 = vadd.xlane.f32.xlu0 %v3441_v38  ;;  %v1439_v38 = vmul.f32 1.442695, %v1429_v57 }
 0x3ce   : > { %2497 = vmatprep.subr.mxu1 %v1787_v63 }
 0x3cf   : > { %2498 = vmatpush3.msra.mxu1 %v1787_v63  ;;  %2670 = vpow2.f32 %v1439_v38 }
 0x3d0   : > { %2672 = vpow2.f32 %v1443_v62 }
 0x3d1   : > { %1138 = vadd.xlane.f32.xlu0 %v3573_v44 }
 0x3d5   : > { %1140 = vadd.xlane.f32.xlu0 %v3578_v2 }
 0x3d9   : > { %1144 = vadd.xlane.f32.xlu0 %v3587_v43  ;;  %v1730_v43 = vsub.f32 %v3554_v9, %v3660_v11 }
 0x3da   : > { %1136 = vadd.xlane.f32.xlu1 %v3571_v36  ;;  %v3731_v36 = vpop.eup %2666 }
 0x3dc   : > { %v1424_v44 = vpop.xlane.xlu0 %1423 }
 0x3dd   : > { %v1433_v4 = vsub.f32 %v3653_v50, %v1424_v44  ;;  %1148 = vadd.xlane.f32.xlu0 %v3599_v0  ;;  %v1740_v0 = vmul.f32 1.442695, %v1730_v43 }
 0x3de   : > { %1142 = vadd.xlane.f32.xlu1 %v3581_v18  ;;  %v3737_v18 = vpop.eup %2668 }
 0x3df   : > { %v1447_v2 = vmul.f32 1.442695, %v1433_v4  ;;  %v3740_v50 = vpop.eup %2670 }
 0x3e0   : > { %v1484_v8 = vpop.permute.xlu0 %1483  ;;  %v3744_v47 = vpop.eup %2672 }
 0x3e1   : > { %1453 = vadd.xlane.f32.xlu0 %v3727_v16  ;;  %2455 = vmatprep.subr.mxu0 %v1484_v8  ;;  %2674 = vpow2.f32 %v1447_v2 }
 0x3e2   : > { %1146 = vadd.xlane.f32.xlu1 %v3595_v5  ;;  %2456 = vmatpush3.msra.mxu0 %v1484_v8  ;;  %2676 = vpow2.f32 %v1740_v0  ;;  %v1744_v5 = vmul.f32 1.442695, %v1732_v28 }
 0x3e4   : > { %2678 = vpow2.f32 %v1744_v5 }
 0x3e5   : > { %1457 = vadd.xlane.f32.xlu0 %v3731_v36 }
 0x3e6   : > { %1451 = vadd.xlane.f32.xlu1 %v3634_v51 }
 0x3e9   : > { %1461 = vadd.xlane.f32.xlu0 %v3737_v18 }
 0x3ea   : > { %1455 = vadd.xlane.f32.xlu1 %v3740_v50 }
 0x3ee   : > { %1459 = vadd.xlane.f32.xlu1 %v3744_v47  ;;  %v3747_v9 = vpop.eup %2674 }
 0x3ef   : > { %v3751_v51 = vpop.eup %2676 }
 0x3f1   : > { %v3754_v31 = vpop.eup %2678 }
 0x3f2   : > { %1463 = vadd.xlane.f32.xlu1 %v3747_v9 }
 0x3f6   : > { %1752 = vadd.xlane.f32.xlu1 %v3632_v13  ;;  %v1731_v13 = vsub.f32 %v3562_v25, %v3662_v27 }
 0x3f8   : > { %v1742_v12 = vmul.f32 1.442695, %v1731_v13 }
 0x3fa   : > { %1756 = vadd.xlane.f32.xlu1 %v3751_v51 }
 0x3fe   : > { %v1426_v11 = vpop.xlane.xlu1 %1425  ;;  %1760 = vadd.xlane.f32.xlu1 %v3754_v31 }
 0x3ff   : > { %v1434_v52 = vsub.f32 %v3671_v32, %v1426_v11 }
 0x401   : > { %v1449_v30 = vmul.f32 1.442695, %v1434_v52 }
 0x402   : > { %v1727_v48 = vpop.xlane.xlu1 %1726 }
 0x403   : > { %2680 = vpow2.f32 %v1449_v30  ;;  %v1735_v6 = vsub.f32 %v3676_v42, %v1727_v48 }
 0x404   : > { %2682 = vpow2.f32 %v1738_v20 }
 0x405   : > { %2684 = vpow2.f32 %v1742_v12  ;;  %v1750_v7 = vmul.f32 1.442695, %v1735_v6  ;;  %v3798_v12 = vpop.f32.mrf.mxu0 }
 0x406   : > { %v1785_v26 = vpop.permute.xlu1 %1784  ;;  %2686 = vpow2.f32 %v1746_v59 }
 0x407   : > { %2499 = vmatprep.subr.mxu1 %v1785_v26  ;;  %2688 = vpow2.f32 %v1750_v7  ;;  %v3800_v59 = vpop.f32.mrf.mxu0 }
 0x408   : > { %2500 = vmatpush3.msra.mxu1 %v1785_v26 }
 0x409   : > { %v3802_v6 = vpop.f32.mrf.mxu0 }
 0x40a   : > { %v1482_v35 = vpop.permute.xlu1 %1481 }
 0x40b   : > { %2457 = vmatprep.subr.mxu0 %v1482_v35 }
 0x40c   : > { %2458 = vmatpush3.msra.mxu0 %v1482_v35 }
 0x40e   : > { %v1783_v32 = vpop.permute.xlu1 %1782 }
 0x40f   : > { %2501 = vmatprep.subr.mxu1 %v1783_v32 }
 0x410   : > { %v3765_v25 = vpop.eup %2680  ;;  %2502 = vmatpush3.msra.mxu1 %v1783_v32 }
 0x411   : > { %1465 = vadd.xlane.f32.xlu0 %v3765_v25  ;;  %v1725_v27 = vpop.xlane.xlu0 %1724  ;;  %v3769_v46 = vpop.eup %2682 }
 0x412   : > { %v1734_v40 = vsub.f32 %v3683_v29, %v1725_v27  ;;  %v1781_v37 = vpop.permute.xlu1 %1780  ;;  %v2685_v23 = vpop.eup %2684 }
 0x413   : > { %2503 = vmatprep.subr.mxu1 %v1781_v37  ;;  %v2687_v49 = vpop.eup %2686 }
 0x414   : > { %v1748_v42 = vmul.f32 1.442695, %v1734_v40  ;;  %2504 = vmatpush3.msra.mxu1 %v1781_v37  ;;  %v2689_v15 = vpop.eup %2688 }
 0x415   : > { %1754 = vadd.xlane.f32.xlu0 %v3769_v46  ;;  %v1480_v24 = vpop.permute.xlu0 %1479 }
 0x416   : > { %2690 = vpow2.f32 %v1748_v42  ;;  %v1478_v34 = vpop.permute.xlu1 %1477  ;;  %2459 = vmatprep.subr.mxu0 %v1480_v24 }
 0x417   : > { %2460 = vmatpush3.msra.mxu0 %v1480_v24 }
 0x418   : > { %2461 = vmatprep.subr.mxu0 %v1478_v34 }
 0x419   : > { %1758 = vadd.xlane.f32.xlu0 %v2685_v23  ;;  %2462 = vmatpush3.msra.mxu0 %v1478_v34  ;;  %v1474_v19 = vpop.permute.xlu0 %1473 }
 0x41a   : > { %v1779_v29 = vpop.permute.xlu1 %1778 }
 0x41b   : > { %2505 = vmatprep.subr.mxu1 %v1779_v29 }
 0x41c   : > { %2506 = vmatpush3.msra.mxu1 %v1779_v29 }
 0x41d   : > { %1762 = vadd.xlane.f32.xlu0 %v2687_v49  ;;  %v1472_v33 = vpop.permute.xlu0 %1471 }
 0x41e   : > { %v1476_v1 = vpop.permute.xlu1 %1475 }
 0x41f   : > { %2463 = vmatprep.subr.mxu0 %v1476_v1 }
 0x420   : > { %2464 = vmatpush3.msra.mxu0 %v1476_v1 }
 0x421   : > { %1766 = vadd.xlane.f32.xlu0 %v2689_v15  ;;  %2465 = vmatprep.subr.mxu0 %v1474_v19  ;;  %v1470_v63 = vpop.permute.xlu0 %1469 }
 0x422   : > { %v1777_v21 = vpop.permute.xlu1 %1776  ;;  %2466 = vmatpush3.msra.mxu0 %v1474_v19 }
 0x423   : > { %v2691_v53 = vpop.eup %2690  ;;  %2467 = vmatprep.subr.mxu0 %v1472_v33  ;;  %2507 = vmatprep.subr.mxu1 %v1777_v21 }
 0x424   : > { %1764 = vadd.xlane.f32.xlu1 %v2691_v53  ;;  %2468 = vmatpush3.msra.mxu0 %v1472_v33 }
 0x425   : > { %883 = vadd.xlane.f32.xlu0 %v3434_v22  ;;  %2469 = vmatprep.subr.mxu0 %v1470_v63  ;;  %v1468_v56 = vpop.permute.xlu0 %1467 }
 0x426   : > { %v1775_v3 = vpop.permute.xlu1 %1774  ;;  %2470 = vmatpush3.msra.mxu0 %v1470_v63  ;;  %2508 = vmatpush3.msra.mxu1 %v1777_v21 }
 0x427   : > { %2471 = vmatprep.subr.mxu0 %v1468_v56  ;;  %2509 = vmatprep.subr.mxu1 %v1775_v3 }
 0x428   : > { %881 = vadd.xlane.f32.xlu1 %v3428_v60  ;;  %2472 = vmatpush3.msra.mxu0 %v1468_v56 }
 0x429   : > { %887 = vadd.xlane.f32.xlu0 %v3484_v54  ;;  %2474 = vmatmul.mubr.f32.vlgmr.msra.gmra.mxu0 %v3727_v16 }
 0x42a   : > { %v1773_v57 = vpop.permute.xlu1 %1772  ;;  %2476 = vmatprep.mubr.f32.mxu0 %v3740_v50  ;;  %2510 = vmatpush3.msra.mxu1 %v1775_v3 }
 0x42b   : > { %2511 = vmatprep.subr.mxu1 %v1773_v57 }
 0x42c   : > { %885 = vadd.xlane.f32.xlu1 %v3475_v61  ;;  %2512 = vmatpush3.msra.mxu1 %v1773_v57 }
 0x42d   : > { %891 = vadd.xlane.f32.xlu0 %v3523_v45  ;;  %2477 = vmatmul.mubr.f32.gmra.mxu0 %v3731_v36 }
 0x42e   : > { %v1771_v22 = vpop.permute.xlu1 %1770  ;;  %2479 = vmatprep.mubr.f32.mxu0 %v3744_v47 }
 0x42f   : > { %2513 = vmatprep.subr.mxu1 %v1771_v22 }
 0x430   : > { %889 = vadd.xlane.f32.xlu1 %v3491_v41  ;;  %2514 = vmatpush3.msra.mxu1 %v1771_v22  ;;  %v2431_v41 = vpop.f32.mrf.mxu1 }
 0x431   : > { %895 = vadd.xlane.f32.xlu0 %v3585_v58  ;;  %2480 = vmatmul.mubr.f32.gmra.mxu0 %v3737_v18 }
 0x432   : > { %v1769_v60 = vpop.permute.xlu1 %1768  ;;  %2482 = vmatprep.mubr.f32.mxu0 %v3747_v9 }
 0x433   : > { %2515 = vmatprep.subr.mxu1 %v1769_v60 }
 0x434   : > { %2516 = vmatpush3.msra.mxu1 %v1769_v60  ;;  %893 = vadd.xlane.f32.xlu1 %v3531_v14  ;;  %v1280_v14 = vpop.f32.mrf.mxu1 }
 0x435   : > { %2483 = vmatmul.mubr.f32.gmra.mxu0 %v3765_v25  ;;  %2518 = vmatmul.mubr.f32.vlgmr.msra.gmra.mxu1 %v3769_v46  ;;  %v3804_v25 = vpop.f32.mrf.mxu0 }
 0x436   : > { %2520 = vmatprep.mubr.f32.mxu1 %v3751_v51  ;;  %v2434_v39 = vpop.f32.mrf.mxu1 }
 0x437   : > { %v3806_v40 = vpop.f32.mrf.mxu0 }
 0x438   : > { %v1290_v2 = vpop.f32.mrf.mxu1 }
 0x439   : > { %2521 = vmatmul.mubr.f32.gmra.mxu1 %v2685_v23  ;;  %v3808_v46 = vpop.f32.mrf.mxu0 }
 0x43a   : > { %2523 = vmatprep.mubr.f32.mxu1 %v3754_v31  ;;  %v2437_v0 = vpop.f32.mrf.mxu1 }
 0x43b   : > { %v3810_v24 = vpop.f32.mrf.mxu0 }
 0x43c   : > { %v1300_v47 = vpop.f32.mrf.mxu1 }
 0x43d   : > { %2524 = vmatmul.mubr.f32.gmra.mxu1 %v2687_v49  ;;  %v3812_v23 = vpop.f32.mrf.mxu0 }
 0x43e   : > { %2526 = vmatprep.mubr.f32.mxu1 %v2691_v53  ;;  %v2440_v31 = vpop.f32.mrf.mxu1 }
 0x440   : > { %v1310_v48 = vpop.f32.mrf.mxu1 }
 0x441   : > { %2527 = vmatmul.mubr.f32.gmra.mxu1 %v2689_v15 }
 0x456   : > { %v1135_v61 = vpop.xlane.xlu0 %1134 }
 0x457   : > { %2692 = vrcp.f32 %v1135_v61 }
 0x45a   : > { %v1139_v54 = vpop.xlane.xlu0 %1138 }
 0x45b   : > { %2694 = vrcp.f32 %v1139_v54 }
 0x45e   : > { %v1141_v45 = vpop.xlane.xlu0 %1140 }
 0x45f   : > { %2696 = vrcp.f32 %v1141_v45 }
 0x462   : > { %v1145_v58 = vpop.xlane.xlu0 %1144 }
 0x463   : > { %2698 = vrcp.f32 %v1145_v58  ;;  %v1137_v10 = vpop.xlane.xlu1 %1136 }
 0x464   : > { %v2693_v38 = vpop.eup %2692  ;;  %2700 = vrcp.f32 %v1137_v10 }
 0x465   : > { %v1327_v62 = vmul.f32 %v2693_v38, %v1280_v14 }
 0x466   : > { %v1149_v44 = vpop.xlane.xlu0 %1148 }
 0x467   : > { %2702 = vrcp.f32 %v1149_v44  ;;  %v1143_v4 = vpop.xlane.xlu1 %1142  ;;  %1945 = vrot.lane.b32.xlu1 %v1327_v62, %s2863_s9 }
 0x468   : > { %v2695_v16 = vpop.eup %2694  ;;  %2704 = vrcp.f32 %v1143_v4 }
 0x469   : > { %v1329_v8 = vmul.f32 %v2695_v16, %v1290_v2 }
 0x46a   : > { %v1454_v13 = vpop.xlane.xlu0 %1453 }
 0x46b   : > { %v1147_v36 = vpop.xlane.xlu1 %1146  ;;  %1949 = vrot.lane.b32.xlu1 %v1329_v8, %s2863_s9 }
 0x46c   : > { %v2697_v43 = vpop.eup %2696  ;;  %2706 = vrcp.f32 %v1147_v36 }
 0x46d   : > { %v1330_v18 = vmul.f32 %v2697_v43, %v2434_v39  ;;  %2708 = vrcp.f32 %v1454_v13 }
 0x46e   : > { %v1458_v17 = vpop.xlane.xlu0 %1457 }
 0x46f   : > { %1951 = vrot.lane.b32.xlu1 %v1330_v18, %s2863_s9  ;;  %v1452_v26 = vpop.xlane.xlu1 %1451 }
 0x470   : > { %v2699_v28 = vpop.eup %2698  ;;  %2710 = vrcp.f32 %v1452_v26 }
 0x471   : > { %v2701_v50 = vpop.eup %2700  ;;  %v1332_v5 = vmul.f32 %v2699_v28, %v2437_v0  ;;  %2712 = vrcp.f32 %v1458_v17 }
 0x472   : > { %v1328_v9 = vmul.f32 %v2701_v50, %v2431_v41  ;;  %v1462_v32 = vpop.xlane.xlu0 %1461 }
 0x473   : > { %1955 = vrot.lane.b32.xlu1 %v1332_v5, %s2863_s9  ;;  %v1456_v35 = vpop.xlane.xlu1 %1455 }
 0x474   : > { %v2703_v51 = vpop.eup %2702  ;;  %1947 = vrot.lane.b32.xlu0 %v1328_v9, %s2863_s9  ;;  %2714 = vrcp.f32 %v1456_v35 }
 0x475   : > { %v2705_v11 = vpop.eup %2704  ;;  %v1334_v55 = vmul.f32 %v2703_v51, %v2440_v31  ;;  %2716 = vrcp.f32 %v1462_v32 }
 0x476   : > { %v1331_v52 = vmul.f32 %v2705_v11, %v1300_v47 }
 0x477   : > { %1959 = vrot.lane.b32.xlu1 %v1334_v55, %s2863_s9  ;;  %v1460_v7 = vpop.xlane.xlu1 %1459 }
 0x478   : > { %1953 = vrot.lane.b32.xlu0 %v1331_v52, %s2863_s9  ;;  %2718 = vrcp.f32 %v1460_v7 }
 0x479   : > { %v2707_v30 = vpop.eup %2706 }
 0x47a   : > { %v1333_v20 = vmul.f32 %v2707_v30, %v1310_v48  ;;  %v2709_v29 = vpop.eup %2708 }
 0x47b   : > { %v1464_v37 = vpop.xlane.xlu1 %1463 }
 0x47c   : > { %1957 = vrot.lane.b32.xlu0 %v1333_v20, %s2863_s9 }
 0x47d   : > { %v2711_v1 = vpop.eup %2710 }
 0x47e   : > { %v2713_v53 = vpop.eup %2712 }
 0x47f   : > { %v1753_v34 = vpop.xlane.xlu1 %1752 }
 0x481   : > { %v2715_v22 = vpop.eup %2714 }
 0x482   : > { %v2717_v54 = vpop.eup %2716 }
 0x483   : > { %v1757_v63 = vpop.xlane.xlu1 %1756 }
 0x485   : > { %v2719_v58 = vpop.eup %2718 }
 0x487   : > { %v1761_v45 = vpop.xlane.xlu1 %1760 }
 0x49a   : > { %v1466_v27 = vpop.xlane.xlu0 %1465 }
 0x49b   : > { %2720 = vrcp.f32 %v1466_v27 }
 0x49c   : > { %2722 = vrcp.f32 %v1464_v37 }
 0x49e   : > { %v1755_v42 = vpop.xlane.xlu0 %1754 }
 0x49f   : > { %2724 = vrcp.f32 %v1755_v42 }
 0x4a0   : > { %2726 = vrcp.f32 %v1753_v34 }
 0x4a2   : > { %v1759_v19 = vpop.xlane.xlu0 %1758 }
 0x4a3   : > { %2728 = vrcp.f32 %v1759_v19 }
 0x4a4   : > { %2730 = vrcp.f32 %v1757_v63 }
 0x4a6   : > { %v1763_v3 = vpop.xlane.xlu0 %1762 }
 0x4a7   : > { %2732 = vrcp.f32 %v1763_v3 }
 0x4a8   : > { %v2721_v62 = vpop.eup %2720  ;;  %2734 = vrcp.f32 %v1761_v45 }
 0x4a9   : > { %v2723_v8 = vpop.eup %2722 }
 0x4aa   : > { %v1767_v38 = vpop.xlane.xlu0 %1766 }
 0x4ab   : > { %2736 = vrcp.f32 %v1767_v38 }
 0x4ac   : > { %v2725_v0 = vpop.eup %2724 }
 0x4ad   : > { %v1765_v16 = vpop.xlane.xlu1 %1764  ;;  %v2727_v5 = vpop.eup %2726 }
 0x4ae   : > { %2738 = vrcp.f32 %v1765_v16 }
 0x4b0   : > { %v2729_v51 = vpop.eup %2728 }
 0x4b1   : > { %v2731_v55 = vpop.eup %2730  ;;  %v882_v42 = vpop.xlane.xlu1 %881 }
 0x4b4   : > { %v2733_v48 = vpop.eup %2732 }
 0x4b5   : > { %v2735_v26 = vpop.eup %2734  ;;  %v886_v34 = vpop.xlane.xlu1 %885 }
 0x4b8   : > { %v2737_v35 = vpop.eup %2736 }
 0x4b9   : > { %v890_v19 = vpop.xlane.xlu1 %889 }
 0x4bb   : > { %v2739_v27 = vpop.eup %2738 }
 0x4e9   : > { %v2475_v49 = vpop.f32.mrf.mxu0 }
 0x4ea   : > { %v1629_v33 = vmul.f32 %v2709_v29, %v2475_v49  ;;  %v884_v29 = vpop.xlane.xlu0 %883  ;;  %v894_v49 = vpop.xlane.xlu1 %893 }
 0x4eb   : > { %v1581_v15 = vpop.f32.mrf.mxu0  ;;  %2740 = vrcp.f32 %v884_v29 }
 0x4ec   : > { %v1628_v21 = vmul.f32 %v2711_v1, %v1581_v15  ;;  %1979 = vrot.lane.b32.xlu1 %v1629_v33, %s2864_s12  ;;  %2742 = vrcp.f32 %v882_v42 }
 0x4ed   : > { %v2478_v56 = vpop.f32.mrf.mxu0 }
 0x4ee   : > { %v1631_v57 = vmul.f32 %v2713_v53, %v2478_v56  ;;  %1977 = vrot.lane.b32.xlu0 %v1628_v21, %s2864_s12  ;;  %v888_v33 = vpop.xlane.xlu0 %887  ;;  %v1946_v1 = vpop.permute.xlu1 %1945 }
 0x4ef   : > { %v1591_v60 = vpop.f32.mrf.mxu0  ;;  %2744 = vrcp.f32 %v888_v33 }
 0x4f0   : > { %v1630_v61 = vmul.f32 %v2715_v22, %v1591_v60  ;;  %1983 = vrot.lane.b32.xlu1 %v1631_v57, %s2864_s12  ;;  %2746 = vrcp.f32 %v886_v34 }
 0x4f1   : > { %v2481_v41 = vpop.f32.mrf.mxu0 }
 0x4f2   : > { %v1633_v14 = vmul.f32 %v2717_v54, %v2481_v41  ;;  %1981 = vrot.lane.b32.xlu0 %v1630_v61, %s2864_s12  ;;  %v892_v15 = vpop.xlane.xlu0 %891  ;;  %v1950_v63 = vpop.permute.xlu1 %1949 }
 0x4f3   : > { %v1601_v10 = vpop.f32.mrf.mxu0  ;;  %2748 = vrcp.f32 %v892_v15 }
 0x4f4   : > { %v1632_v39 = vmul.f32 %v2719_v58, %v1601_v10  ;;  %1987 = vrot.lane.b32.xlu1 %v1633_v14, %s2864_s12  ;;  %2750 = vrcp.f32 %v890_v19 }
 0x4f5   : > { %v2484_v44 = vpop.f32.mrf.mxu0  ;;  %v2519_v4 = vpop.f32.mrf.mxu1 }
 0x4f6   : > { %v1635_v2 = vmul.f32 %v2721_v62, %v2484_v44  ;;  %1985 = vrot.lane.b32.xlu0 %v1632_v39, %s2864_s12  ;;  %v1930_v50 = vmul.f32 %v2725_v0, %v2519_v4  ;;  %v896_v21 = vpop.xlane.xlu0 %895  ;;  %v1952_v53 = vpop.permute.xlu1 %1951 }
 0x4f7   : > { %v1611_v36 = vpop.f32.mrf.mxu0  ;;  %v1882_v43 = vpop.f32.mrf.mxu1  ;;  %2752 = vrcp.f32 %v896_v21 }
 0x4f8   : > { %v1634_v18 = vmul.f32 %v2723_v8, %v1611_v36  ;;  %1991 = vrot.lane.b32.xlu1 %v1635_v2, %s2864_s12  ;;  %v1929_v9 = vmul.f32 %v2727_v5, %v1882_v43  ;;  %v2741_v58 = vpop.eup %2740  ;;  %2754 = vrcp.f32 %v894_v49  ;;  %v3842_v8 = vld [vmem:[%s3960_s5] ss:$0 sm:$0xff] }
 0x4f9   : > { %v2522_v28 = vpop.f32.mrf.mxu1  ;;  %v2743_v38 = vpop.eup %2742  ;;  %v1011_v62 = vmul.f32 %v2741_v58, %v3798_v12 }
 0x4fa   : > { %1989 = vrot.lane.b32.xlu0 %v1634_v18, %s2864_s12  ;;  %v1932_v11 = vmul.f32 %v2729_v51, %v2522_v28  ;;  %v1948_v56 = vpop.permute.xlu0 %1947  ;;  %v1956_v3 = vpop.permute.xlu1 %1955  ;;  %v1010_v16 = vmul.f32 %v2743_v38, %v3800_v59 }
 0x4fb   : > { %v1892_v47 = vpop.f32.mrf.mxu1  ;;  %v2035_v2 = vsel %vm2033_vm7, %v1011_v62, %v1948_v56 }
 0x4fc   : > { %2011 = vrot.lane.b32.xlu1 %v1930_v50, %s2862_s23  ;;  %v1931_v30 = vmul.f32 %v2731_v55, %v1892_v47  ;;  %v2745_v44 = vpop.eup %2744  ;;  %v2034_v12 = vsel %vm2033_vm7, %v1010_v16, %v1946_v1 }
 0x4fd   : > { %v2525_v31 = vpop.f32.mrf.mxu1  ;;  %v2747_v36 = vpop.eup %2746  ;;  %v1013_v0 = vmul.f32 %v2745_v44, %v3802_v6 }
 0x4fe   : > { %2009 = vrot.lane.b32.xlu0 %v1929_v9, %s2862_s23  ;;  %v1934_v13 = vmul.f32 %v2733_v48, %v2525_v31  ;;  %v3830_v57 = vpop.permute.xlu0 %1953  ;;  %v3832_v22 = vpop.permute.xlu1 %1959  ;;  %v1012_v9 = vmul.f32 %v2747_v36, %v3804_v25 }
 0x4ff   : > { %v1902_v52 = vpop.f32.mrf.mxu1  ;;  %v2037_v51 = vsel %vm2033_vm7, %v1013_v0, %v1952_v53 }
 0x500   : > { %2015 = vrot.lane.b32.xlu1 %v1932_v11, %s2862_s23  ;;  %v1933_v17 = vmul.f32 %v2735_v26, %v1902_v52  ;;  %v2749_v50 = vpop.eup %2748 }
 0x501   : > { %v2528_v20 = vpop.f32.mrf.mxu1  ;;  %v2751_v11 = vpop.eup %2750  ;;  %v1015_v48 = vmul.f32 %v2749_v50, %v3806_v40 }
 0x502   : > { %2013 = vrot.lane.b32.xlu0 %v1931_v30, %s2862_s23  ;;  %v1936_v7 = vmul.f32 %v2737_v35, %v2528_v20  ;;  %v3834_v60 = vpop.permute.xlu0 %1957  ;;  %v2036_v30 = vsel %vm2033_vm7, %v1012_v9, %v1950_v63 }
 0x503   : > { %v1912_v32 = vpop.f32.mrf.mxu1  ;;  %v2039_v35 = vsel %vm2033_vm7, %v1015_v48, %v1956_v3 }
 0x504   : > { %2019 = vrot.lane.b32.xlu1 %v1934_v13, %s2862_s23  ;;  %v1935_v37 = vmul.f32 %v2739_v27, %v1912_v32  ;;  %v2753_v20 = vpop.eup %2752  ;;  %v1014_v32 = vmul.f32 %v2751_v11, %v3808_v46 }
 0x505   : > { %v2755_v27 = vpop.eup %2754  ;;  %v1017_v34 = vmul.f32 %v2753_v20, %v3810_v24 }
 0x506   : > { %2017 = vrot.lane.b32.xlu0 %v1933_v17, %s2862_s23  ;;  %v2038_v19 = vsel %vm2033_vm7, %v1014_v32, %v3830_v57  ;;  %v1016_v15 = vmul.f32 %v2755_v27, %v3812_v23 }
 0x507   : > { %v2041_v1 = vsel %vm2033_vm7, %v1017_v34, %v3832_v22 }
 0x508   : > { %2023 = vrot.lane.b32.xlu1 %v1936_v7, %s2862_s23  ;;  %v2040_v56 = vsel %vm2033_vm7, %v1016_v15, %v3834_v60 }
 0x50a   : > { %2021 = vrot.lane.b32.xlu0 %v1935_v37, %s2862_s23 }
 0x55e   : > { %v1980_v61 = vpop.permute.xlu1 %1979 }
 0x55f   : > { %v2044_v43 = vsel %vm2042_vm0, %v2035_v2, %v1980_v61 }
 0x560   : > { %v1978_v54 = vpop.permute.xlu0 %1977 }
 0x561   : > { %v2043_v59 = vsel %vm2042_vm0, %v2034_v12, %v1978_v54 }
 0x562   : > { %v1984_v41 = vpop.permute.xlu1 %1983 }
 0x563   : > { %v2046_v6 = vsel %vm2042_vm0, %v2037_v51, %v1984_v41 }
 0x564   : > { %v1982_v45 = vpop.permute.xlu0 %1981 }
 0x565   : > { %v2045_v13 = vsel %vm2042_vm0, %v2036_v30, %v1982_v45 }
 0x566   : > { %v1988_v14 = vpop.permute.xlu1 %1987 }
 0x567   : > { %v2048_v40 = vsel %vm2042_vm0, %v2039_v35, %v1988_v14 }
 0x568   : > { %v1986_v10 = vpop.permute.xlu0 %1985 }
 0x569   : > { %v2047_v46 = vsel %vm2042_vm0, %v2038_v19, %v1986_v10 }
 0x56a   : > { %v1992_v39 = vpop.permute.xlu1 %1991 }
 0x56b   : > { %v2050_v63 = vsel %vm2042_vm0, %v2041_v1, %v1992_v39 }
 0x56c   : > { %v1990_v4 = vpop.permute.xlu0 %1989 }
 0x56d   : > { %v2049_v23 = vsel %vm2042_vm0, %v2040_v56, %v1990_v4 }
 0x56e   : > { %v2012_v18 = vpop.permute.xlu1 %2011 }
 0x56f   : > { %v2053_v28 = vsel %vm2051_vm15, %v2044_v43, %v2012_v18 }
 0x570   : > { %v2067_v5 = vadd.f32 %v3842_v8, %v2053_v28  ;;  %v2010_v47 = vpop.permute.xlu0 %2009 }
 0x571   : > { %v2052_v31 = vsel %vm2051_vm15, %v2043_v59, %v2010_v47 }
 0x572   : > { %2075 = vst [vmem:[%s2995_s11 + $0x8] sm:$0xff] %v2067_v5  ;;  %v2066_v55 = vadd.f32 %v3842_v8, %v2052_v31  ;;  %v2016_v52 = vpop.permute.xlu1 %2015 }
 0x573   : > { %v2055_v25 = vsel %vm2051_vm15, %v2046_v6, %v2016_v52 }
 0x574   : > { %2074 = vst [vmem:[%s2995_s11] sm:$0xff] %v2066_v55  ;;  %v2069_v26 = vadd.f32 %v3842_v8, %v2055_v25  ;;  %v2014_v17 = vpop.permute.xlu0 %2013 }
 0x575   : > { %v2054_v7 = vsel %vm2051_vm15, %v2045_v13, %v2014_v17 }
 0x576   : > { %2077 = vst [vmem:[%s2995_s11 + $0x18] sm:$0xff] %v2069_v26  ;;  %v2068_v37 = vadd.f32 %v3842_v8, %v2054_v7  ;;  %v2020_v42 = vpop.permute.xlu1 %2019 }
 0x577   : > { %v2057_v29 = vsel %vm2051_vm15, %v2048_v40, %v2020_v42 }
 0x578   : > { %2076 = vst [vmem:[%s2995_s11 + $0x10] sm:$0xff] %v2068_v37  ;;  %v2071_v49 = vadd.f32 %v3842_v8, %v2057_v29  ;;  %v2018_v33 = vpop.permute.xlu0 %2017 }
 0x579   : > { %v2056_v24 = vsel %vm2051_vm15, %v2047_v46, %v2018_v33 }
 0x57a   : > { %2079 = vst [vmem:[%s2995_s11 + $0x28] sm:$0xff] %v2071_v49  ;;  %v2070_v21 = vadd.f32 %v3842_v8, %v2056_v24  ;;  %v2024_v53 = vpop.permute.xlu1 %2023 }
 0x57b   : > { %v2059_v3 = vsel %vm2051_vm15, %v2050_v63, %v2024_v53 }
 0x57c   : > { %2078 = vst [vmem:[%s2995_s11 + $0x20] sm:$0xff] %v2070_v21  ;;  %v2073_v57 = vadd.f32 %v3842_v8, %v2059_v3  ;;  %v2022_v22 = vpop.permute.xlu0 %2021 }
 0x57d   : > { %v2058_v61 = vsel %vm2051_vm15, %v2049_v23, %v2022_v22 }
 0x57e   : > { %2081 = vst [vmem:[%s2995_s11 + $0x38] sm:$0xff] %v2073_v57  ;;  %v2072_v60 = vadd.f32 %v3842_v8, %v2058_v61 }
 0x580   : > { %2080 = vst [vmem:[%s2995_s11 + $0x30] sm:$0xff] %v2072_v60 }
 0x581   : > { %2775 = shalt.err (!%p2772_p9)
}
 0x582   : > { %s2776_s11 = scalar_lea.hbm %s3895_s7, 1024  ;;  %s2780_s12 = scalar_lea.hbm %s3961_s6, 4096 }
 0x583   : > { %p2777_p10 = scmp.ne.s32.totalorder %s3895_s7, %s2776_s11  ;;  %p2781_p13 = scmp.lt.s32.totalorder %s3895_s7, %s3961_s6 }
 0x584   : > { %p2782_p0 = scmp.lt.s32.totalorder %s2780_s12, %s2776_s11 }
 0x585   : > { %p2778_p11 = pnand %p2777_p10, %p2954_p3 }
 0x586   : > { %p2783_p1 = por %p2782_p0, %p2781_p13 }
 0x587   : > { %p2779_p12 = pneg %p2778_p11 }
 0x589   : > { %p2784_p2 = pnand %p2783_p1, %p2779_p12 }
 0x58b   : > { %2787 = shalt.err (!%p2784_p2)
}
 0x58c   : > { %s2866_s20 = smov 128   ;;  %s2867_s30 = smov 8  }
 0x58d   : > { %2533 = dma.vmem_to_hbm [thread:$0]  (%p2954_p3), %s3897_s29, 1024, %s3895_s7, %s3904_s15, %s2866_s20, %s2866_s20, %s2867_s30  }
 0x58e PF: > { %p2539_p4 = scmp.ge.s32.totalorder %s2854_s28, 2  ;;  %s2113_s25 = sand.u32 1, %s2826_s21  }
 0x58f   : > { %s2114_s19 = scalar_lea.sflag [#allocation6], %s2113_s25 }
 0x590   : > { %p2536_p5 = pnand %p2539_p4, %p2963_p8 }
 0x592   : > { %p2537_p6 = pneg %p2536_p5 }
 0x594   : > { %2821 = dma.done.wait (%p2537_p6), %s2114_s19, 1024  }
 0x595   : > { %2823 = vsyncadd (%p2537_p6), %s2114_s19, 4294966272  ;;  %s19_s28 = sadd.s32 1, %s2854_s28   ;;  %s3998_s27 = sld [smem:[#allocation8_spill]] }
 0x596   : > { %p16_p7 = scmp.ge.s32.totalorder %s19_s28, 6   ;;  %s3999_s23 = sld [smem:[#allocation14_spill]] }
 0x597   : > { %s4000_s24 = sld [smem:[#allocation9_spill]]  ;;  %s4004_s21 = smov %s2830_s22 }
 0x598   : > { %s4001_s25 = sld [smem:[#allocation10_spill]] }
 0x599   : > { %s4002_s26 = sld [smem:[#allocation11_spill]] }
 0x59a   : > { %s4003_s10 = sld [smem:[#allocation12_spill]] }
 0x59b   : > { %s4005_s22 = smov %s3998_s27 }
 0x59c   :  { %18 = sbr.rel (!%p16_p7) target bundleno = 5 (0x5), region = 90 }
 0x5a0   : > { %s4006_s27 = smov %s4003_s10 }
 0x5a1   :  { %2119 = vsyncpa [#allocation6], 1 }
 0x5a2   :  { %2121 = vsyncpa [#allocation6 + $0x1], 1 }

</bundles_post_ra>
